<compile_context>
chip_gen: v7x
topology: tpu7x:2x2x1
jax: 0.10.0
libtpu: 0.0.40
codegen_flags: <defaults>
</compile_context>

<pallas_src>
import jax
import jax.numpy as jnp
from jax.experimental import pallas as pl
from jax.experimental.pallas import tpu as pltpu


# ---------------------------------------------------------------------------
# Kernel
# ---------------------------------------------------------------------------
# Packed-bias layout (all starts 128-lane aligned):
#   [0:128)   fc1      [128:256) afc      [256:512) gate (vis|aud)
#   [512:640) fusion   [640:832) fc2 (att|v|a)      [896:1024) packed heads
def fnet11_kernel(vx_ref, ax_ref,
                  w_fc1, w_afc, w_gate_v, w_gate_a,
                  w_fus_v, w_fus_a, w_fc2_att, w_fc2_v, w_fc2_a, w_head,
                  b_ref,
                  heads_ref, attx_ref, vo1_ref, a1_ref):
    f32 = jnp.float32
    bf16 = jnp.bfloat16

    def dot(x, w_ref):
        # bf16 x bf16 operands on the MXU, f32 accumulation.
        return jnp.dot(x, w_ref[...], preferred_element_type=f32)

    relu = lambda t: jnp.maximum(t, 0.0)

    b_fc1 = b_ref[:, 0:128]
    b_afc = b_ref[:, 128:256]
    b_gate = b_ref[:, 256:512]
    b_fus = b_ref[:, 512:640]
    b_fc2 = b_ref[:, 640:832]
    b_head = b_ref[:, 896:1024]

    # vo1 = relu(dropout(fc1(vx)));  a1 = relu(dropout(afc(ax)))  (dropout = id)
    vo1 = relu(dot(vx_ref[...], w_fc1) + b_fc1)          # (tile, 128) f32
    a1 = relu(dot(ax_ref[...], w_afc) + b_afc)           # (tile, 128) f32
    vo1_b = vo1.astype(bf16)
    a1_b = a1.astype(bf16)

    # Both attention gates via split-K dots (no [vo1|a1] concat):
    #   cols 0:128  -> visual gate pre-act,  cols 128:256 -> audio gate pre-act.
    gates = jax.nn.sigmoid(dot(vo1_b, w_gate_v) + dot(a1_b, w_gate_a) + b_gate)
    gv = gates[:, :128]
    ga = gates[:, 128:]
    v_att = gv * vo1 + (1.0 - gv) * a1                    # visual_att_net(vo1, a1)
    a_att = ga * a1 + (1.0 - ga) * vo1                    # audio_att_net(a1, vo1)

    # attx = relu(fusion(cat(visual_att_x, audio_att_x))) as two split-K dots.
    attx = relu(dot(v_att.astype(bf16), w_fus_v)
                + dot(a_att.astype(bf16), w_fus_a) + b_fus)   # (tile, 128) f32

    # Block-diagonal fused fc2: h = [att_h | v_h | a_h]  (tile, 192), no concat.
    h = relu(dot(attx.astype(bf16), w_fc2_att)
             + dot(vo1_b, w_fc2_v)
             + dot(a1_b, w_fc2_a) + b_fc2)

    # Packed scalar heads -> one lane-dense (tile, 128) slab, cols 0..2 used.
    heads = dot(h.astype(bf16), w_head) + b_head

    heads_ref[...] = heads.astype(heads_ref.dtype)
    attx_ref[...] = attx.astype(attx_ref.dtype)
    vo1_ref[...] = vo1.astype(vo1_ref.dtype)
    a1_ref[...] = a1.astype(a1_ref.dtype)


# ---------------------------------------------------------------------------
# Parameters
# ---------------------------------------------------------------------------
def _uniform_linear(key, in_dim, out_dim):
    """PyTorch nn.Linear default init: U(-1/sqrt(in), 1/sqrt(in)).
    Weight already transposed to (in, out); bias as (1, out)."""
    kw, kb = jax.random.split(key)
    bound = 1.0 / jnp.sqrt(jnp.float32(in_dim))
    w = jax.random.uniform(kw, (in_dim, out_dim), jnp.float32, -bound, bound)
    b = jax.random.uniform(kb, (1, out_dim), jnp.float32, -bound, bound)
    return w, b


def init_params(key, feature_dim=512):
    dims = [
        ("fc1",    feature_dim, 128),
        ("afc",    128, 128),
        ("vam1",   128, 128),   # visual_att_net (invented AM), branch on arg 1
        ("vam2",   128, 128),   # visual_att_net, branch on arg 2
        ("aam1",   128, 128),   # audio_att_net, branch on arg 1
        ("aam2",   128, 128),   # audio_att_net, branch on arg 2
        ("fusion", 256, 128),
        ("attfc2", 128, 64),
        ("attfc3", 64, 1),
        ("vfc2",   128, 64),
        ("vfc3",   64, 1),
        ("afc2",   128, 64),
        ("afc3",   64, 1),
    ]
    keys = jax.random.split(key, len(dims))
    return {name: _uniform_linear(k, din, dout)
            for k, (name, din, dout) in zip(keys, dims)}


def prepare_fused_params(params, compute_dtype=jnp.bfloat16):
    """Host-side weight fusion + bf16 cast.  Biases packed into one f32 ref."""
    w_fc1, b_fc1 = params["fc1"]
    w_afc, b_afc = params["afc"]
    wv1, bv1 = params["vam1"]
    wv2, bv2 = params["vam2"]
    wa1, ba1 = params["aam1"]
    wa2, ba2 = params["aam2"]
    w_fus, b_fus = params["fusion"]
    w_att2, b_att2 = params["attfc2"]
    w_att3, b_att3 = params["attfc3"]
    w_v2, b_v2 = params["vfc2"]
    w_v3, b_v3 = params["vfc3"]
    w_a2, b_a2 = params["afc2"]
    w_a3, b_a3 = params["afc3"]

    # Fused attention gates, split by input activation (K=128 each):
    #   gate_pre = vo1 @ w_gate_v + a1 @ w_gate_a + b_gate
    #   cols   0:128 : visual gate = vo1@wv1 + a1@wv2 + (bv1+bv2)
    #   cols 128:256 : audio  gate = vo1@wa2 + a1@wa1 + (ba1+ba2)
    w_gate_v = jnp.concatenate([wv1, wa2], axis=1)          # (128, 256)
    w_gate_a = jnp.concatenate([wv2, wa1], axis=1)          # (128, 256)
    b_gate = jnp.concatenate([bv1 + bv2, ba1 + ba2], axis=-1)   # (1, 256)

    # fusion split by half of the concatenated [v_att | a_att] input.
    w_fus_v = w_fus[:128]                                   # (128, 128)
    w_fus_a = w_fus[128:]                                   # (128, 128)

    # Block-diagonal fc2 as three K=128 -> 192 contributions (zero blocks free).
    w_fc2_att = jnp.zeros((128, 192), jnp.float32).at[:, 0:64].set(w_att2)
    w_fc2_v = jnp.zeros((128, 192), jnp.float32).at[:, 64:128].set(w_v2)
    w_fc2_a = jnp.zeros((128, 192), jnp.float32).at[:, 128:192].set(w_a2)
    b_fc2 = jnp.concatenate([b_att2, b_v2, b_a2], axis=-1)      # (1, 192)

    # Packed scalar heads: (192) -> lane-dense 128, cols 0..2 = att/v/a outs.
    w_head = jnp.zeros((192, 128), jnp.float32)
    w_head = w_head.at[0:64, 0:1].set(w_att3)
    w_head = w_head.at[64:128, 1:2].set(w_v3)
    w_head = w_head.at[128:192, 2:3].set(w_a3)
    b_head = jnp.zeros((1, 128), jnp.float32)
    b_head = b_head.at[:, 0:1].set(b_att3)
    b_head = b_head.at[:, 1:2].set(b_v3)
    b_head = b_head.at[:, 2:3].set(b_a3)

    # Pack all biases into one lane-aligned (1, 1024) f32 array.
    b_all = jnp.zeros((1, 1024), jnp.float32)
    b_all = b_all.at[:, 0:128].set(b_fc1)
    b_all = b_all.at[:, 128:256].set(b_afc)
    b_all = b_all.at[:, 256:512].set(b_gate)
    b_all = b_all.at[:, 512:640].set(b_fus)
    b_all = b_all.at[:, 640:832].set(b_fc2)
    b_all = b_all.at[:, 896:1024].set(b_head)

    cast = lambda w: w.astype(compute_dtype)
    weights = [cast(w) for w in (
        w_fc1, w_afc, w_gate_v, w_gate_a,
        w_fus_v, w_fus_a, w_fc2_att, w_fc2_v, w_fc2_a, w_head)]
    return weights, b_all


# ---------------------------------------------------------------------------
# Wrapper
# ---------------------------------------------------------------------------
def _round_up(x, m):
    return ((x + m - 1) // m) * m


def _cdiv(a, b):
    return -(-a // b)


def fnet11_forward(vx, ax, params, tile_b=1024,
                   aux_dtype=jnp.bfloat16, heads_dtype=jnp.bfloat16):
    B, feature_dim = vx.shape

    # bf16 inputs: halves input HBM traffic (weights are bf16 on the MXU anyway).
    vx = vx.astype(jnp.bfloat16)
    ax = ax.astype(jnp.bfloat16)

    # Adaptive tile: >=2 grid steps whenever possible (feeds both v7x TCs),
    # tile <= tile_b, minimal batch padding (never pad up to a full tile_b).
    bp8 = _round_up(max(B, 8), 8)
    min_steps = 1 if bp8 <= 8 else 2
    n_steps = max(min_steps, _cdiv(bp8, tile_b))
    tile = _round_up(_cdiv(bp8, n_steps), 8)
    bp = tile * n_steps
    if bp != B:
        vx = jnp.pad(vx, ((0, bp - B), (0, 0)))
        ax = jnp.pad(ax, ((0, bp - B), (0, 0)))

    weights, b_all = prepare_fused_params(params)

    act_in_specs = [
        pl.BlockSpec((tile, feature_dim), lambda i: (i, 0)),
        pl.BlockSpec((tile, 128), lambda i: (i, 0)),
    ]
    # Weights/bias: constant index map -> fetched once, VMEM-resident.
    weight_specs = ([pl.BlockSpec(w.shape, lambda i: (0, 0)) for w in weights]
                    + [pl.BlockSpec(b_all.shape, lambda i: (0, 0))])

    out_shapes = (
        jax.ShapeDtypeStruct((bp, 128), heads_dtype),   # packed heads (cols 0..2)
        jax.ShapeDtypeStruct((bp, 128), aux_dtype),     # attx
        jax.ShapeDtypeStruct((bp, 128), aux_dtype),     # vo1
        jax.ShapeDtypeStruct((bp, 128), aux_dtype),     # a1 (post afc + relu)
    )
    out_specs = tuple(pl.BlockSpec((tile, 128), lambda i: (i, 0))
                      for _ in out_shapes)

    # Advisory cost estimate (mem-bound kernel): actual bytes moved + MXU flops.
    bytes_in = int(vx.size) * 2 + int(ax.size) * 2
    bytes_w = sum(int(w.size) * 2 for w in weights) + int(b_all.size) * 4
    bytes_out = sum(2 * bp * 128 for _ in out_shapes)
    cost = pl.CostEstimate(flops=557056 * bp,
                           transcendentals=256 * bp,
                           bytes_accessed=bytes_in + bytes_w + bytes_out)

    heads, attx, vo1, a1 = pl.pallas_call(
        fnet11_kernel,
        out_shape=out_shapes,
        grid=(n_steps,),
        in_specs=act_in_specs + weight_specs,
        out_specs=out_specs,
        compiler_params=pltpu.CompilerParams(
            dimension_semantics=("parallel",),
            vmem_limit_bytes=48 * 1024 * 1024),
        cost_estimate=cost,
    )(vx, ax, *weights, b_all)

    att_out = heads[:B, 0:1].astype(jnp.float32)
    vout = heads[:B, 1:2].astype(jnp.float32)
    aout = heads[:B, 2:3].astype(jnp.float32)
    # attx/vo1/a1 are returned in bf16 (their precision is already bf16-matmul
    # limited); cast at the call site if f32 is required, or drop them entirely
    # to save ~0.75 KB/row of HBM writeback when only the heads are needed.
    return att_out, vout, aout, attx[:B], vo1[:B], a1[:B]


# ---------------------------------------------------------------------------
# Pure-JAX reference (mirrors the kernel's bf16-weight/activation numerics)
# ---------------------------------------------------------------------------
def fnet11_reference(vx, ax, params):
    bf = lambda t: t.astype(jnp.bfloat16).astype(jnp.float32)

    def lin(x, name):
        w, b = params[name]
        return jnp.dot(bf(x), bf(w)) + b

    relu = lambda t: jnp.maximum(t, 0.0)
    vo1 = relu(lin(vx, "fc1"))
    a1 = relu(lin(ax, "afc"))
    gv = jax.nn.sigmoid(lin(vo1, "vam1") + lin(a1, "vam2"))
    ga = jax.nn.sigmoid(lin(a1, "aam1") + lin(vo1, "aam2"))
    v_att = gv * vo1 + (1.0 - gv) * a1
    a_att = ga * a1 + (1.0 - ga) * vo1
    attx = relu(lin(jnp.concatenate([v_att, a_att], axis=-1), "fusion"))
    att_out = lin(relu(lin(attx, "attfc2")), "attfc3")
    vout = lin(relu(lin(vo1, "vfc2")), "vfc3")
    aout = lin(relu(lin(a1, "afc2")), "afc3")
    return att_out, vout, aout, attx, vo1, a1


if __name__ == "__main__":
    key = jax.random.PRNGKey(0)
    k_vx, k_ax, k_params = jax.random.split(key, 3)

    B, feature_dim = 2, 512
    vx = jax.random.normal(k_vx, (B, feature_dim), jnp.float32)
    ax = jax.random.normal(k_ax, (B, 128), jnp.float32)

    params = init_params(k_params, feature_dim=feature_dim)

    outs = jax.block_until_ready(fnet11_forward(vx, ax, params))
    att_out, vout, aout, attx, vo1, a1 = outs

    # Shapes implied by the PyTorch forward.
    assert att_out.shape == (B, 1)
    assert vout.shape == (B, 1)
    assert aout.shape == (B, 1)
    assert attx.shape == (B, 128)
    assert vo1.shape == (B, 128)
    assert a1.shape == (B, 128)

    # Numerical check against a pure-JAX reference with matching bf16 weights.
    # (bf16 output storage adds <0.4% relative rounding, well inside 2e-2.)
    ref = fnet11_reference(vx, ax, params)
    for got, want in zip(outs, ref):
        g = got.astype(jnp.float32)
        assert jnp.allclose(g, want, atol=2e-2, rtol=2e-2), (
            "max abs err", float(jnp.max(jnp.abs(g - want))))

    print("KERNEL_OK")
</pallas_src>

<mosaic_0001>
module attributes {stable_mosaic.version = 11 : i64} {
  func.func @fnet11_kernel(%arg0: i32, %arg1: memref<8x512xbf16, #tpu.memory_space<vmem>>, %arg2: memref<8x128xbf16, #tpu.memory_space<vmem>>, %arg3: memref<512x128xbf16, #tpu.memory_space<vmem>>, %arg4: memref<128x128xbf16, #tpu.memory_space<vmem>>, %arg5: memref<128x256xbf16, #tpu.memory_space<vmem>>, %arg6: memref<128x256xbf16, #tpu.memory_space<vmem>>, %arg7: memref<128x128xbf16, #tpu.memory_space<vmem>>, %arg8: memref<128x128xbf16, #tpu.memory_space<vmem>>, %arg9: memref<128x192xbf16, #tpu.memory_space<vmem>>, %arg10: memref<128x192xbf16, #tpu.memory_space<vmem>>, %arg11: memref<128x192xbf16, #tpu.memory_space<vmem>>, %arg12: memref<192x128xbf16, #tpu.memory_space<vmem>>, %arg13: memref<1x1024xf32, #tpu.memory_space<vmem>>, %arg14: memref<8x128xbf16, #tpu.memory_space<vmem>>, %arg15: memref<8x128xbf16, #tpu.memory_space<vmem>>, %arg16: memref<8x128xbf16, #tpu.memory_space<vmem>>, %arg17: memref<8x128xbf16, #tpu.memory_space<vmem>>) attributes {dimension_semantics = [#tpu.dimension_semantics<parallel>], iteration_bounds = array<i64: 1>, scalar_prefetch = 0 : i64, scratch_operands = 0 : i64, tpu.core_type = #tpu.core_type<tc>, window_params = [{transform_indices = @transform_0, window_bounds = array<i64: 8, 512>}, {transform_indices = @transform_1, window_bounds = array<i64: 8, 128>}, {pipeline_mode = #tpu.pipeline_mode<synchronous>, transform_indices = @transform_2, window_bounds = array<i64: 512, 128>}, {pipeline_mode = #tpu.pipeline_mode<synchronous>, transform_indices = @transform_3, window_bounds = array<i64: 128, 128>}, {pipeline_mode = #tpu.pipeline_mode<synchronous>, transform_indices = @transform_4, window_bounds = array<i64: 128, 256>}, {pipeline_mode = #tpu.pipeline_mode<synchronous>, transform_indices = @transform_5, window_bounds = array<i64: 128, 256>}, {pipeline_mode = #tpu.pipeline_mode<synchronous>, transform_indices = @transform_6, window_bounds = array<i64: 128, 128>}, {pipeline_mode = #tpu.pipeline_mode<synchronous>, transform_indices = @transform_7, window_bounds = array<i64: 128, 128>}, {pipeline_mode = #tpu.pipeline_mode<synchronous>, transform_indices = @transform_8, window_bounds = array<i64: 128, 192>}, {pipeline_mode = #tpu.pipeline_mode<synchronous>, transform_indices = @transform_9, window_bounds = array<i64: 128, 192>}, {pipeline_mode = #tpu.pipeline_mode<synchronous>, transform_indices = @transform_10, window_bounds = array<i64: 128, 192>}, {pipeline_mode = #tpu.pipeline_mode<synchronous>, transform_indices = @transform_11, window_bounds = array<i64: 192, 128>}, {pipeline_mode = #tpu.pipeline_mode<synchronous>, transform_indices = @transform_12, window_bounds = array<i64: 1, 1024>}, {transform_indices = @transform_13, window_bounds = array<i64: 8, 128>}, {transform_indices = @transform_14, window_bounds = array<i64: 8, 128>}, {transform_indices = @transform_15, window_bounds = array<i64: 8, 128>}, {transform_indices = @transform_16, window_bounds = array<i64: 8, 128>}]} {
    %c0 = arith.constant 0 : index
    %c0_0 = arith.constant 0 : index
    %0 = vector.load %arg13[%c0, %c0_0] : memref<1x1024xf32, #tpu.memory_space<vmem>>, vector<1x128xf32>
    %c0_1 = arith.constant 0 : index
    %c128 = arith.constant 128 : index
    %1 = vector.load %arg13[%c0_1, %c128] : memref<1x1024xf32, #tpu.memory_space<vmem>>, vector<1x128xf32>
    %c0_2 = arith.constant 0 : index
    %c256 = arith.constant 256 : index
    %2 = vector.load %arg13[%c0_2, %c256] : memref<1x1024xf32, #tpu.memory_space<vmem>>, vector<1x256xf32>
    %c0_3 = arith.constant 0 : index
    %c512 = arith.constant 512 : index
    %3 = vector.load %arg13[%c0_3, %c512] : memref<1x1024xf32, #tpu.memory_space<vmem>>, vector<1x128xf32>
    %c0_4 = arith.constant 0 : index
    %c640 = arith.constant 640 : index
    %4 = vector.load %arg13[%c0_4, %c640] : memref<1x1024xf32, #tpu.memory_space<vmem>>, vector<1x192xf32>
    %c0_5 = arith.constant 0 : index
    %c896 = arith.constant 896 : index
    %5 = vector.load %arg13[%c0_5, %c896] : memref<1x1024xf32, #tpu.memory_space<vmem>>, vector<1x128xf32>
    %c0_6 = arith.constant 0 : index
    %c0_7 = arith.constant 0 : index
    %6 = vector.load %arg1[%c0_6, %c0_7] : memref<8x512xbf16, #tpu.memory_space<vmem>>, vector<8x512xbf16>
    %c0_8 = arith.constant 0 : index
    %c0_9 = arith.constant 0 : index
    %7 = vector.load %arg3[%c0_8, %c0_9] : memref<512x128xbf16, #tpu.memory_space<vmem>>, vector<512x128xbf16>
    %cst = arith.constant dense<0.000000e+00> : vector<8x128xf32>
    %8 = tpu.matmul %6, %7, %cst {dimension_numbers = #tpu.dot_dimension_numbers<[1], [0], [0], [1], [0, 0, 1, 1], [], []>} : vector<8x512xbf16>, vector<512x128xbf16>, vector<8x128xf32> -> vector<8x128xf32>
    %9 = vector.broadcast %0 : vector<1x128xf32> to vector<8x128xf32>
    %10 = arith.addf %8, %9 : vector<8x128xf32>
    %cst_10 = arith.constant 0.000000e+00 : f32
    %11 = vector.broadcast %cst_10 : f32 to vector<8x128xf32>
    %12 = arith.maximumf %10, %11 : vector<8x128xf32>
    %c0_11 = arith.constant 0 : index
    %c0_12 = arith.constant 0 : index
    %13 = vector.load %arg2[%c0_11, %c0_12] : memref<8x128xbf16, #tpu.memory_space<vmem>>, vector<8x128xbf16>
    %c0_13 = arith.constant 0 : index
    %c0_14 = arith.constant 0 : index
    %14 = vector.load %arg4[%c0_13, %c0_14] : memref<128x128xbf16, #tpu.memory_space<vmem>>, vector<128x128xbf16>
    %cst_15 = arith.constant dense<0.000000e+00> : vector<8x128xf32>
    %15 = tpu.matmul %13, %14, %cst_15 {dimension_numbers = #tpu.dot_dimension_numbers<[1], [0], [0], [1], [0, 0, 1, 1], [], []>} : vector<8x128xbf16>, vector<128x128xbf16>, vector<8x128xf32> -> vector<8x128xf32>
    %16 = vector.broadcast %1 : vector<1x128xf32> to vector<8x128xf32>
    %17 = arith.addf %15, %16 : vector<8x128xf32>
    %cst_16 = arith.constant 0.000000e+00 : f32
    %18 = vector.broadcast %cst_16 : f32 to vector<8x128xf32>
    %19 = arith.maximumf %17, %18 : vector<8x128xf32>
    %20 = arith.truncf %12 : vector<8x128xf32> to vector<8x128xbf16>
    %21 = arith.truncf %19 : vector<8x128xf32> to vector<8x128xbf16>
    %c0_17 = arith.constant 0 : index
    %c0_18 = arith.constant 0 : index
    %22 = vector.load %arg5[%c0_17, %c0_18] : memref<128x256xbf16, #tpu.memory_space<vmem>>, vector<128x256xbf16>
    %cst_19 = arith.constant dense<0.000000e+00> : vector<8x256xf32>
    %23 = tpu.matmul %20, %22, %cst_19 {dimension_numbers = #tpu.dot_dimension_numbers<[1], [0], [0], [1], [0, 0, 1, 1], [], []>} : vector<8x128xbf16>, vector<128x256xbf16>, vector<8x256xf32> -> vector<8x256xf32>
    %c0_20 = arith.constant 0 : index
    %c0_21 = arith.constant 0 : index
    %24 = vector.load %arg6[%c0_20, %c0_21] : memref<128x256xbf16, #tpu.memory_space<vmem>>, vector<128x256xbf16>
    %cst_22 = arith.constant dense<0.000000e+00> : vector<8x256xf32>
    %25 = tpu.matmul %21, %24, %cst_22 {dimension_numbers = #tpu.dot_dimension_numbers<[1], [0], [0], [1], [0, 0, 1, 1], [], []>} : vector<8x128xbf16>, vector<128x256xbf16>, vector<8x256xf32> -> vector<8x256xf32>
    %26 = arith.addf %23, %25 : vector<8x256xf32>
    %27 = vector.broadcast %2 : vector<1x256xf32> to vector<8x256xf32>
    %28 = arith.addf %26, %27 : vector<8x256xf32>
    %29 = arith.negf %28 : vector<8x256xf32>
    %30 = math.exp %29 : vector<8x256xf32>
    %cst_23 = arith.constant 1.000000e+00 : f32
    %31 = vector.broadcast %cst_23 : f32 to vector<8x256xf32>
    %32 = arith.addf %31, %30 : vector<8x256xf32>
    %33 = arith.divf %31, %32 : vector<8x256xf32>
    %34 = vector.extract_strided_slice %33 {offsets = [0, 0], sizes = [8, 128], strides = [1, 1]} : vector<8x256xf32> to vector<8x128xf32>
    %35 = vector.extract_strided_slice %33 {offsets = [0, 128], sizes = [8, 128], strides = [1, 1]} : vector<8x256xf32> to vector<8x128xf32>
    %36 = arith.mulf %34, %12 : vector<8x128xf32>
    %cst_24 = arith.constant 1.000000e+00 : f32
    %37 = vector.broadcast %cst_24 : f32 to vector<8x128xf32>
    %38 = arith.subf %37, %34 : vector<8x128xf32>
    %39 = arith.mulf %38, %19 : vector<8x128xf32>
    %40 = arith.addf %36, %39 : vector<8x128xf32>
    %41 = arith.mulf %35, %19 : vector<8x128xf32>
    %cst_25 = arith.constant 1.000000e+00 : f32
    %42 = vector.broadcast %cst_25 : f32 to vector<8x128xf32>
    %43 = arith.subf %42, %35 : vector<8x128xf32>
    %44 = arith.mulf %43, %12 : vector<8x128xf32>
    %45 = arith.addf %41, %44 : vector<8x128xf32>
    %46 = arith.truncf %40 : vector<8x128xf32> to vector<8x128xbf16>
    %c0_26 = arith.constant 0 : index
    %c0_27 = arith.constant 0 : index
    %47 = vector.load %arg7[%c0_26, %c0_27] : memref<128x128xbf16, #tpu.memory_space<vmem>>, vector<128x128xbf16>
    %cst_28 = arith.constant dense<0.000000e+00> : vector<8x128xf32>
    %48 = tpu.matmul %46, %47, %cst_28 {dimension_numbers = #tpu.dot_dimension_numbers<[1], [0], [0], [1], [0, 0, 1, 1], [], []>} : vector<8x128xbf16>, vector<128x128xbf16>, vector<8x128xf32> -> vector<8x128xf32>
    %49 = arith.truncf %45 : vector<8x128xf32> to vector<8x128xbf16>
    %c0_29 = arith.constant 0 : index
    %c0_30 = arith.constant 0 : index
    %50 = vector.load %arg8[%c0_29, %c0_30] : memref<128x128xbf16, #tpu.memory_space<vmem>>, vector<128x128xbf16>
    %cst_31 = arith.constant dense<0.000000e+00> : vector<8x128xf32>
    %51 = tpu.matmul %49, %50, %cst_31 {dimension_numbers = #tpu.dot_dimension_numbers<[1], [0], [0], [1], [0, 0, 1, 1], [], []>} : vector<8x128xbf16>, vector<128x128xbf16>, vector<8x128xf32> -> vector<8x128xf32>
    %52 = arith.addf %48, %51 : vector<8x128xf32>
    %53 = vector.broadcast %3 : vector<1x128xf32> to vector<8x128xf32>
    %54 = arith.addf %52, %53 : vector<8x128xf32>
    %cst_32 = arith.constant 0.000000e+00 : f32
    %55 = vector.broadcast %cst_32 : f32 to vector<8x128xf32>
    %56 = arith.maximumf %54, %55 : vector<8x128xf32>
    %57 = arith.truncf %56 : vector<8x128xf32> to vector<8x128xbf16>
    %c0_33 = arith.constant 0 : index
    %c0_34 = arith.constant 0 : index
    %58 = vector.load %arg9[%c0_33, %c0_34] : memref<128x192xbf16, #tpu.memory_space<vmem>>, vector<128x192xbf16>
    %cst_35 = arith.constant dense<0.000000e+00> : vector<8x192xf32>
    %59 = tpu.matmul %57, %58, %cst_35 {dimension_numbers = #tpu.dot_dimension_numbers<[1], [0], [0], [1], [0, 0, 1, 1], [], []>} : vector<8x128xbf16>, vector<128x192xbf16>, vector<8x192xf32> -> vector<8x192xf32>
    %c0_36 = arith.constant 0 : index
    %c0_37 = arith.constant 0 : index
    %60 = vector.load %arg10[%c0_36, %c0_37] : memref<128x192xbf16, #tpu.memory_space<vmem>>, vector<128x192xbf16>
    %cst_38 = arith.constant dense<0.000000e+00> : vector<8x192xf32>
    %61 = tpu.matmul %20, %60, %cst_38 {dimension_numbers = #tpu.dot_dimension_numbers<[1], [0], [0], [1], [0, 0, 1, 1], [], []>} : vector<8x128xbf16>, vector<128x192xbf16>, vector<8x192xf32> -> vector<8x192xf32>
    %62 = arith.addf %59, %61 : vector<8x192xf32>
    %c0_39 = arith.constant 0 : index
    %c0_40 = arith.constant 0 : index
    %63 = vector.load %arg11[%c0_39, %c0_40] : memref<128x192xbf16, #tpu.memory_space<vmem>>, vector<128x192xbf16>
    %cst_41 = arith.constant dense<0.000000e+00> : vector<8x192xf32>
    %64 = tpu.matmul %21, %63, %cst_41 {dimension_numbers = #tpu.dot_dimension_numbers<[1], [0], [0], [1], [0, 0, 1, 1], [], []>} : vector<8x128xbf16>, vector<128x192xbf16>, vector<8x192xf32> -> vector<8x192xf32>
    %65 = arith.addf %62, %64 : vector<8x192xf32>
    %66 = vector.broadcast %4 : vector<1x192xf32> to vector<8x192xf32>
    %67 = arith.addf %65, %66 : vector<8x192xf32>
    %cst_42 = arith.constant 0.000000e+00 : f32
    %68 = vector.broadcast %cst_42 : f32 to vector<8x192xf32>
    %69 = arith.maximumf %67, %68 : vector<8x192xf32>
    %70 = arith.truncf %69 : vector<8x192xf32> to vector<8x192xbf16>
    %c0_43 = arith.constant 0 : index
    %c0_44 = arith.constant 0 : index
    %71 = vector.load %arg12[%c0_43, %c0_44] : memref<192x128xbf16, #tpu.memory_space<vmem>>, vector<192x128xbf16>
    %cst_45 = arith.constant dense<0.000000e+00> : vector<8x128xf32>
    %72 = tpu.matmul %70, %71, %cst_45 {dimension_numbers = #tpu.dot_dimension_numbers<[1], [0], [0], [1], [0, 0, 1, 1], [], []>} : vector<8x192xbf16>, vector<192x128xbf16>, vector<8x128xf32> -> vector<8x128xf32>
    %73 = vector.broadcast %5 : vector<1x128xf32> to vector<8x128xf32>
    %74 = arith.addf %72, %73 : vector<8x128xf32>
    %75 = arith.truncf %74 : vector<8x128xf32> to vector<8x128xbf16>
    %c0_46 = arith.constant 0 : index
    %c0_47 = arith.constant 0 : index
    %76 = vector.load %arg14[%c0_46, %c0_47] : memref<8x128xbf16, #tpu.memory_space<vmem>>, vector<8x128xbf16>
    tpu.vector_store %arg14[%c0_46, %c0_47], %75 {strides = array<i32>} : memref<8x128xbf16, #tpu.memory_space<vmem>>, vector<8x128xbf16>,
    %77 = arith.truncf %56 : vector<8x128xf32> to vector<8x128xbf16>
    %c0_48 = arith.constant 0 : index
    %c0_49 = arith.constant 0 : index
    %78 = vector.load %arg15[%c0_48, %c0_49] : memref<8x128xbf16, #tpu.memory_space<vmem>>, vector<8x128xbf16>
    tpu.vector_store %arg15[%c0_48, %c0_49], %77 {strides = array<i32>} : memref<8x128xbf16, #tpu.memory_space<vmem>>, vector<8x128xbf16>,
    %79 = arith.truncf %12 : vector<8x128xf32> to vector<8x128xbf16>
    %c0_50 = arith.constant 0 : index
    %c0_51 = arith.constant 0 : index
    %80 = vector.load %arg16[%c0_50, %c0_51] : memref<8x128xbf16, #tpu.memory_space<vmem>>, vector<8x128xbf16>
    tpu.vector_store %arg16[%c0_50, %c0_51], %79 {strides = array<i32>} : memref<8x128xbf16, #tpu.memory_space<vmem>>, vector<8x128xbf16>,
    %81 = arith.truncf %19 : vector<8x128xf32> to vector<8x128xbf16>
    %c0_52 = arith.constant 0 : index
    %c0_53 = arith.constant 0 : index
    %82 = vector.load %arg17[%c0_52, %c0_53] : memref<8x128xbf16, #tpu.memory_space<vmem>>, vector<8x128xbf16>
    tpu.vector_store %arg17[%c0_52, %c0_53], %81 {strides = array<i32>} : memref<8x128xbf16, #tpu.memory_space<vmem>>, vector<8x128xbf16>,
    return
  }
  func.func @transform_0(%arg0: i32) -> (i32, i32) {
    %c0_i32 = arith.constant 0 : i32
    %c0_i32_0 = arith.constant 0 : i32
    return %arg0, %c0_i32 : i32, i32
  }
  func.func @transform_1(%arg0: i32) -> (i32, i32) {
    %c0_i32 = arith.constant 0 : i32
    %c0_i32_0 = arith.constant 0 : i32
    return %arg0, %c0_i32 : i32, i32
  }
  func.func @transform_2(%arg0: i32) -> (i32, i32) {
    %c0_i32 = arith.constant 0 : i32
    %c0_i32_0 = arith.constant 0 : i32
    %c0_i32_1 = arith.constant 0 : i32
    return %c0_i32, %c0_i32_0 : i32, i32
  }
  func.func @transform_3(%arg0: i32) -> (i32, i32) {
    %c0_i32 = arith.constant 0 : i32
    %c0_i32_0 = arith.constant 0 : i32
    %c0_i32_1 = arith.constant 0 : i32
    return %c0_i32, %c0_i32_0 : i32, i32
  }
  func.func @transform_4(%arg0: i32) -> (i32, i32) {
    %c0_i32 = arith.constant 0 : i32
    %c0_i32_0 = arith.constant 0 : i32
    %c0_i32_1 = arith.constant 0 : i32
    return %c0_i32, %c0_i32_0 : i32, i32
  }
  func.func @transform_5(%arg0: i32) -> (i32, i32) {
    %c0_i32 = arith.constant 0 : i32
    %c0_i32_0 = arith.constant 0 : i32
    %c0_i32_1 = arith.constant 0 : i32
    return %c0_i32, %c0_i32_0 : i32, i32
  }
  func.func @transform_6(%arg0: i32) -> (i32, i32) {
    %c0_i32 = arith.constant 0 : i32
    %c0_i32_0 = arith.constant 0 : i32
    %c0_i32_1 = arith.constant 0 : i32
    return %c0_i32, %c0_i32_0 : i32, i32
  }
  func.func @transform_7(%arg0: i32) -> (i32, i32) {
    %c0_i32 = arith.constant 0 : i32
    %c0_i32_0 = arith.constant 0 : i32
    %c0_i32_1 = arith.constant 0 : i32
    return %c0_i32, %c0_i32_0 : i32, i32
  }
  func.func @transform_8(%arg0: i32) -> (i32, i32) {
    %c0_i32 = arith.constant 0 : i32
    %c0_i32_0 = arith.constant 0 : i32
    %c0_i32_1 = arith.constant 0 : i32
    return %c0_i32, %c0_i32_0 : i32, i32
  }
  func.func @transform_9(%arg0: i32) -> (i32, i32) {
    %c0_i32 = arith.constant 0 : i32
    %c0_i32_0 = arith.constant 0 : i32
    %c0_i32_1 = arith.constant 0 : i32
    return %c0_i32, %c0_i32_0 : i32, i32
  }
  func.func @transform_10(%arg0: i32) -> (i32, i32) {
    %c0_i32 = arith.constant 0 : i32
    %c0_i32_0 = arith.constant 0 : i32
    %c0_i32_1 = arith.constant 0 : i32
    return %c0_i32, %c0_i32_0 : i32, i32
  }
  func.func @transform_11(%arg0: i32) -> (i32, i32) {
    %c0_i32 = arith.constant 0 : i32
    %c0_i32_0 = arith.constant 0 : i32
    %c0_i32_1 = arith.constant 0 : i32
    return %c0_i32, %c0_i32_0 : i32, i32
  }
  func.func @transform_12(%arg0: i32) -> (i32, i32) {
    %c0_i32 = arith.constant 0 : i32
    %c0_i32_0 = arith.constant 0 : i32
    %c0_i32_1 = arith.constant 0 : i32
    return %c0_i32, %c0_i32_0 : i32, i32
  }
  func.func @transform_13(%arg0: i32) -> (i32, i32) {
    %c0_i32 = arith.constant 0 : i32
    %c0_i32_0 = arith.constant 0 : i32
    return %arg0, %c0_i32 : i32, i32
  }
  func.func @transform_14(%arg0: i32) -> (i32, i32) {
    %c0_i32 = arith.constant 0 : i32
    %c0_i32_0 = arith.constant 0 : i32
    return %arg0, %c0_i32 : i32, i32
  }
  func.func @transform_15(%arg0: i32) -> (i32, i32) {
    %c0_i32 = arith.constant 0 : i32
    %c0_i32_0 = arith.constant 0 : i32
    return %arg0, %c0_i32 : i32, i32
  }
  func.func @transform_16(%arg0: i32) -> (i32, i32) {
    %c0_i32 = arith.constant 0 : i32
    %c0_i32_0 = arith.constant 0 : i32
    return %arg0, %c0_i32 : i32, i32
  }
}

</mosaic_0001>

<bundles_post_ra>
// kernel: tpu_custom_call.1
= control target key start
LH: loop header
LB: loop body
LE: loop exit
PB: predicated region body
PF: predicated region fallthrough
CT: control target
= control target key end

     0   :  { %s3149_s0 = inlined_call_operand.hbm [shape: bf16[8,512], index: 0, kind: input, shape index: {}]   ;;  %s3150_s1 = inlined_call_operand.hbm [shape: bf16[8,128], index: 1, kind: input, shape index: {}]   ;;  %s3151_s2 = inlined_call_operand.vmem [shape: bf16[512,128], index: 2, kind: input, shape index: {}]   ;;  %s3152_s3 = inlined_call_operand.vmem [shape: bf16[128,128], index: 3, kind: input, shape index: {}]   ;;  %s3153_s4 = inlined_call_operand.vmem [shape: bf16[128,256], index: 4, kind: input, shape index: {}]   ;;  %s3154_s5 = inlined_call_operand.vmem [shape: bf16[128,256], index: 5, kind: input, shape index: {}]   ;;  %s3155_s6 = inlined_call_operand.hbm [shape: bf16[128,128], index: 6, kind: input, shape index: {}]   ;;  %s3156_s7 = inlined_call_operand.hbm [shape: bf16[128,128], index: 7, kind: input, shape index: {}]   ;;  %s3157_s8 = inlined_call_operand.vmem [shape: bf16[128,192], index: 8, kind: input, shape index: {}]   ;;  %s3158_s9 = inlined_call_operand.vmem [shape: bf16[128,192], index: 9, kind: input, shape index: {}]   ;;  %s3159_s10 = inlined_call_operand.vmem [shape: bf16[128,192], index: 10, kind: input, shape index: {}]   ;;  %s3160_s11 = inlined_call_operand.hbm [shape: bf16[192,128], index: 11, kind: input, shape index: {}]   ;;  %s3161_s12 = inlined_call_operand.vmem [shape: f32[1,1024], index: 12, kind: input, shape index: {}]   ;;  %s3162_s13 = inlined_call_operand.hbm [shape: bf16[8,128], index: 13, kind: output, shape index: {0}]   ;;  %s3163_s14 = inlined_call_operand.hbm [shape: bf16[8,128], index: 14, kind: output, shape index: {1}]   ;;  %s3164_s15 = inlined_call_operand.hbm [shape: bf16[8,128], index: 15, kind: output, shape index: {2}]   ;;  %s3165_s16 = inlined_call_operand.hbm [shape: bf16[8,128], index: 16, kind: output, shape index: {3}]  }
   0x1   :  { %3167 = sst [smem:[#allocation23_spill]] %s3149_s0 }
   0x2   :  { %22 = vsyncpa [#allocation3], 0 }
   0x3   :  { %23 = vsyncpa [#allocation6], 0 }
   0x4   :  { %24 = vsyncpa [#allocation9], 0 }
   0x5   :  { %25 = vsyncpa [#allocation4], 0 }
   0x6   :  { %26 = vsyncpa [#allocation13], 0 }
   0x7   :  { %27 = vsyncpa [#allocation16], 0  ;;  %s2474_s21 = smov [#allocation5]   ;;  %s2264_s25 = scalar_lea.hbm %s3150_s1, 64 }
   0x8   :  { %s44_s22 = sshll.u32 %s2474_s21, 4  ;;  %p2265_p0 = scmp.ne.s32.totalorder %s3150_s1, %s2264_s25  ;;  %s45_s22 = int_to_ptr.vmem [resolvable:$true] %s44_s22 }
   0x9   :  { %p2268_p1 = scmp.lt.u32.totalorder %s2264_s25, %s3150_s1 }
   0xb   :  { %p2270_p2 = pnand %p2268_p1, %p2265_p0 }
   0xd   :  { %2273 = shalt.err (!%p2270_p2)
}
   0xe   :  { %s2274_s30 = scalar_lea.vmem %s45_s22, 64  ;;  %p2279_p4 = scmp.lt.s32.totalorder %s45_s22, %s45_s22 }
   0xf   :  { %p2275_p3 = scmp.ne.s32.totalorder %s45_s22, %s2274_s30  ;;  %p2280_p5 = scmp.lt.s32.totalorder %s2274_s30, %s2274_s30 }
  0x11   :  { %p2281_p6 = por %p2280_p5, %p2279_p4 }
  0x13   :  { %p2282_p7 = pnand %p2281_p6, %p2275_p3 }
  0x15   :  { %2285 = shalt.err (!%p2282_p7)
}
  0x16   :  { %47 = dma.hbm_to_vmem [thread:$0]  %s3150_s1, 64, %s45_s22, [#allocation6]  }
  0x17   :  { %s2475_s18 = smov [#allocation8]   ;;  %s2476_s20 = smov [#allocation2]  }
  0x18   :  { %s73_s19 = sshll.u32 %s2475_s18, 4  ;;  %s34_s21 = sshll.u32 %s2476_s20, 4  ;;  %s74_s19 = int_to_ptr.vmem [resolvable:$true] %s73_s19  ;;  %s35_s21 = int_to_ptr.vmem [resolvable:$true] %s34_s21 }
  0x19   :  { %s2286_s25 = scalar_lea.hbm %s3156_s7, 1024 }
  0x1a   :  { %p2287_p8 = scmp.ne.s32.totalorder %s3156_s7, %s2286_s25  ;;  %p2290_p9 = scmp.lt.u32.totalorder %s2286_s25, %s3156_s7 }
  0x1c   :  { %p2292_p10 = pnand %p2290_p9, %p2287_p8 }
  0x1e   :  { %2295 = shalt.err (!%p2292_p10)
}
  0x1f   :  { %s2296_s1 = scalar_lea.vmem %s74_s19, 1024  ;;  %p2301_p12 = scmp.lt.s32.totalorder %s74_s19, %s74_s19 }
  0x20   :  { %p2297_p11 = scmp.ne.s32.totalorder %s74_s19, %s2296_s1  ;;  %p2302_p13 = scmp.lt.s32.totalorder %s2296_s1, %s2296_s1 }
  0x22   :  { %p2303_p0 = por %p2302_p13, %p2301_p12 }
  0x24   :  { %p2304_p1 = pnand %p2303_p0, %p2297_p11 }
  0x26   :  { %2307 = shalt.err (!%p2304_p1)
}
  0x27   :  { %s2477_s22 = smov 64   ;;  %s2478_s30 = smov 4  }
  0x28   :  { %79 = dma.hbm_to_vmem [thread:$0]  %s3156_s7, 1024, %s74_s19, [#allocation9], %s2477_s22, %s2477_s22, %s2478_s30  }
  0x29   :  { %s3168_s23 = sld [smem:[#allocation23_spill]] }
  0x2f   :  { %s2308_s24 = scalar_lea.hbm %s3168_s23, 256 }
  0x30   :  { %p2309_p2 = scmp.ne.s32.totalorder %s3168_s23, %s2308_s24  ;;  %p2312_p3 = scmp.lt.u32.totalorder %s2308_s24, %s3168_s23 }
  0x32   :  { %p2314_p4 = pnand %p2312_p3, %p2309_p2 }
  0x34   :  { %2317 = shalt.err (!%p2314_p4)
}
  0x35   :  { %s2318_s29 = scalar_lea.vmem %s35_s21, 256  ;;  %p2323_p6 = scmp.lt.s32.totalorder %s35_s21, %s35_s21 }
  0x36   :  { %p2319_p5 = scmp.ne.s32.totalorder %s35_s21, %s2318_s29  ;;  %p2324_p7 = scmp.lt.s32.totalorder %s2318_s29, %s2318_s29 }
  0x38   :  { %p2325_p8 = por %p2324_p7, %p2323_p6 }
  0x3a   :  { %p2326_p9 = pnand %p2325_p8, %p2319_p5 }
  0x3c   :  { %2329 = shalt.err (!%p2326_p9)
}
  0x3d   :  { %37 = dma.hbm_to_vmem [thread:$0]  %s3168_s23, 256, %s35_s21, [#allocation3]  }
  0x3e   :  { %s2479_s1 = smov [#allocation7]   ;;  %s2480_s17 = smov [#allocation10]  }
  0x3f   :  { %s61_s0 = sshll.u32 %s2479_s1, 4  ;;  %s91_s18 = sshll.u32 %s2480_s17, 4  ;;  %s62_s0 = int_to_ptr.vmem [resolvable:$true] %s61_s0  ;;  %s92_s18 = int_to_ptr.vmem [resolvable:$true] %s91_s18 }
  0x40   :  { %s2330_s25 = scalar_lea.hbm %s3155_s6, 1024 }
  0x41   :  { %p2331_p10 = scmp.ne.s32.totalorder %s3155_s6, %s2330_s25  ;;  %p2334_p11 = scmp.lt.u32.totalorder %s2330_s25, %s3155_s6 }
  0x43   :  { %p2336_p12 = pnand %p2334_p11, %p2331_p10 }
  0x45   :  { %2339 = shalt.err (!%p2336_p12)
}
  0x46   :  { %s2340_s21 = scalar_lea.vmem %s62_s0, 1024  ;;  %p2345_p0 = scmp.lt.s32.totalorder %s62_s0, %s62_s0 }
  0x47   :  { %p2341_p13 = scmp.ne.s32.totalorder %s62_s0, %s2340_s21  ;;  %p2346_p1 = scmp.lt.s32.totalorder %s2340_s21, %s2340_s21 }
  0x49   :  { %p2347_p2 = por %p2346_p1, %p2345_p0 }
  0x4b   :  { %p2348_p3 = pnand %p2347_p2, %p2341_p13 }
  0x4d   :  { %2351 = shalt.err (!%p2348_p3)
}
  0x4e   :  { %67 = dma.hbm_to_vmem [thread:$0]  %s3155_s6, 1024, %s62_s0, [#allocation6], %s2477_s22, %s2477_s22, %s2478_s30  }
  0x4f   :  { %s2352_s17 = scalar_lea.hbm %s3160_s11, 1536 }
  0x50   :  { %p2353_p4 = scmp.ne.s32.totalorder %s3160_s11, %s2352_s17  ;;  %p2356_p5 = scmp.lt.u32.totalorder %s2352_s17, %s3160_s11 }
  0x52   :  { %p2358_p6 = pnand %p2356_p5, %p2353_p4 }
  0x54   :  { %2361 = shalt.err (!%p2358_p6)
}
  0x55   :  { %s2362_s27 = scalar_lea.vmem %s92_s18, 1536  ;;  %p2367_p8 = scmp.lt.s32.totalorder %s92_s18, %s92_s18 }
  0x56   :  { %p2363_p7 = scmp.ne.s32.totalorder %s92_s18, %s2362_s27  ;;  %p2368_p9 = scmp.lt.s32.totalorder %s2362_s27, %s2362_s27 }
  0x58   :  { %p2369_p10 = por %p2368_p9, %p2367_p8 }
  0x5a   :  { %p2370_p11 = pnand %p2369_p10, %p2363_p7 }
  0x5c   :  { %2373 = shalt.err (!%p2370_p11)
}
  0x5d   :  { %97 = dma.hbm_to_vmem [thread:$0]  %s3160_s11, 1536, %s92_s18, [#allocation9], %s2477_s22, %s2477_s22, %s2478_s30  }
  0x5e   :  { %2462 = dma.done.wait [#allocation3], 256  }
  0x5f   :  { %2463 = vsyncadd [#allocation3], 4294967040 }
  0x60   :  { %2464 = dma.done.wait [#allocation6], 1088  }
  0x61   :  { %2465 = vsyncadd [#allocation6], 4294966208 }
  0x62   :  { %2466 = dma.done.wait [#allocation9], 2560  }
  0x63   :  { %2467 = vsyncadd [#allocation9], 4294964736  ;;  %v2481_v0 = vmov 0.0   ;;  %vm2482_vm0 = vmmov 0   ;;  %v2064_v1 = vld [vmem:[%s3151_s2 + $0x40] sm:$0xff]   ;;  %v2066_v3 = vld [vmem:[%s3151_s2 + $0x48] sm:$0xff]  }
  0x64   :  { %1990 = vmatprep.subr.bf16.mxu0 %v2481_v0  ;;  %2006 = vmatprep.mubr.msk.bf16.mxu0 %vm2482_vm0, %v2481_v0  ;;  %v2065_v2 = vld [vmem:[%s3151_s2] sm:$0xff]   ;;  %v2067_v4 = vld [vmem:[%s3151_s2 + $0x8] sm:$0xff]   ;;  %v2068_v5 = vld [vmem:[%s3151_s2 + $0x50] sm:$0xff]   ;;  %vm1653_vm1 = vcmask 523264   ;;  %s2484_s17 = smov [#allocation12]  }
  0x65   :  { %1919 = vmatprep.subr.bf16.mxu1 %v2064_v1  ;;  %v2069_v6 = vld [vmem:[%s3151_s2 + $0x10] sm:$0xff]   ;;  %v2070_v7 = vld [vmem:[%s3151_s2 + $0x58] sm:$0xff]   ;;  %v2072_v9 = vld [vmem:[%s3151_s2 + $0x60] sm:$0xff]   ;;  %s1718_s20 = sshll.u32 %s2484_s17, 4  ;;  %s1719_s20 = int_to_ptr.vmem [resolvable:$true] %s1718_s20 }
  0x66   :  { %1920 = vmatpush3.bf16.msra.mxu1 %v2065_v2  ;;  %v2071_v8 = vld [vmem:[%s3151_s2 + $0x18] sm:$0xff]   ;;  %v2073_v10 = vld [vmem:[%s3151_s2 + $0x20] sm:$0xff]   ;;  %v2074_v11 = vld [vmem:[%s3151_s2 + $0x68] sm:$0xff]   ;;  %s2374_s24 = scalar_lea.vmem %s1719_s20, 64  ;;  %p2379_p13 = scmp.lt.s32.totalorder %s1719_s20, %s1719_s20 }
  0x67   :  { %1921 = vmatprep.subr.bf16.mxu1 %v2066_v3  ;;  %v122_v12 = vld [vmem:[#allocation2] sm:$0xff]  ;;  %v2075_v14 = vld [vmem:[%s3151_s2 + $0x28] sm:$0xff]   ;;  %v2076_v16 = vld [vmem:[%s3151_s2 + $0x70] sm:$0xff]   ;;  %p2375_p12 = scmp.ne.s32.totalorder %s1719_s20, %s2374_s24  ;;  %p2380_p0 = scmp.lt.s32.totalorder %s2374_s24, %s2374_s24 }
  0x68   :  { %v1762_v13 = vcombine.high %v122_v12, %v122_v12  ;;  %v2084_v15 = vld [vmem:[%s3152_s3] sm:$0xff]   ;;  %v2087_v17 = vld [vmem:[%s3152_s3 + $0x8] sm:$0xff]   ;;  %v2077_v18 = vld [vmem:[%s3151_s2 + $0x30] sm:$0xff]   ;;  %v1761_v24 = vcombine.low %v122_v12, %v122_v12 }
  0x69   :  { %1991 = vmatpush3.bf16.msra.mxu0 %v2084_v15  ;;  %v2078_v19 = vld [vmem:[%s3151_s2 + $0x78] sm:$0xff]   ;;  %v2090_v20 = vld [vmem:[%s3152_s3 + $0x10] sm:$0xff]   ;;  %v2082_v22 = vld [vmem:[%s3151_s2 + $0xc0] sm:$0xff]   ;;  %p2381_p1 = por %p2380_p0, %p2379_p13 }
  0x6a   :  { %1922 = vmatpush3.bf16.msra.mxu1 %v2067_v4  ;;  %432 = vmatprep.mubr.bf16.mxu1 %v1762_v13  ;;  %v2079_v21 = vld [vmem:[%s3151_s2 + $0x38] sm:$0xff]   ;;  %v2083_v25 = vld [vmem:[%s3151_s2 + $0x80] sm:$0xff]   ;;  %v2085_v26 = vld [vmem:[%s3151_s2 + $0xc8] sm:$0xff]  }
  0x6b   :  { %1923 = vmatprep.subr.bf16.mxu1 %v2068_v5  ;;  %1992 = vmatprep.subr.bf16.mxu0 %v2481_v0  ;;  %v2093_v23 = vld [vmem:[%s3152_s3 + $0x18] sm:$0xff]   ;;  %v2096_v27 = vld [vmem:[%s3152_s3 + $0x20] sm:$0xff]   ;;  %v2086_v28 = vld [vmem:[%s3151_s2 + $0x88] sm:$0xff]   ;;  %p2382_p2 = pnand %p2381_p1, %p2375_p12 }
  0x6c   :  { %v2088_v29 = vld [vmem:[%s3151_s2 + $0xd0] sm:$0xff]   ;;  %v2099_v30 = vld [vmem:[%s3152_s3 + $0x28] sm:$0xff]   ;;  %v2091_v32 = vld [vmem:[%s3151_s2 + $0xd8] sm:$0xff]  }
  0x6d   :  { %1993 = vmatpush3.bf16.msra.mxu0 %v2087_v17  ;;  %v2089_v31 = vld [vmem:[%s3151_s2 + $0x90] sm:$0xff]   ;;  %v123_v34 = vld [vmem:[#allocation2 + $0x8] sm:$0xff]  ;;  %v2092_v35 = vld [vmem:[%s3151_s2 + $0x98] sm:$0xff]   ;;  %v2483_v17 = vmov 0  }
  0x6e   :  { %1924 = vmatpush3.bf16.msra.mxu1 %v2069_v6  ;;  %1994 = vmatprep.subr.bf16.mxu0 %v2481_v0  ;;  %v2102_v33 = vld [vmem:[%s3152_s3 + $0x30] sm:$0xff]   ;;  %v1764_v36 = vcombine.high %v123_v34, %v123_v34  ;;  %v2094_v37 = vld [vmem:[%s3151_s2 + $0xe0] sm:$0xff]   ;;  %v2105_v38 = vld [vmem:[%s3152_s3 + $0x38] sm:$0xff]   ;;  %v1763_v47 = vcombine.low %v123_v34, %v123_v34 }
  0x6f   :  { %1925 = vmatprep.subr.bf16.mxu1 %v2070_v7  ;;  %v2095_v39 = vld [vmem:[%s3151_s2 + $0xa0] sm:$0xff]   ;;  %v2097_v40 = vld [vmem:[%s3151_s2 + $0xe8] sm:$0xff]   ;;  %v481_v41 = vld [vmem:[#allocation5] sm:$0xf] }
  0x70   :  { %v2098_v42 = vld [vmem:[%s3151_s2 + $0xa8] sm:$0xff]   ;;  %v2100_v43 = vld [vmem:[%s3151_s2 + $0xf0] sm:$0xff]   ;;  %v2103_v45 = vld [vmem:[%s3151_s2 + $0xf8] sm:$0xff]  }
  0x71   :  { %1995 = vmatpush3.bf16.msra.mxu0 %v2090_v20  ;;  %v2101_v44 = vld [vmem:[%s3151_s2 + $0xb0] sm:$0xff]   ;;  %v2104_v46 = vld [vmem:[%s3151_s2 + $0xb8] sm:$0xff]   ;;  %v2108_v48 = vld [vmem:[%s3154_s5] ss:$8 sps:$4 sm:$0xff]  }
  0x72   :  { %1926 = vmatpush3.bf16.msra.mxu1 %v2071_v8  ;;  %1996 = vmatprep.subr.bf16.mxu0 %v2481_v0  ;;  %v2110_v49 = vld [vmem:[%s3154_s5 + $0x4] ss:$8 sps:$4 sm:$0xff]   ;;  %v2111_v50 = vld [vmem:[%s3153_s4] ss:$8 sps:$4 sm:$0xff]   ;;  %v2116_v52 = vld [vmem:[%s3154_s5 + $0x14] ss:$8 sps:$4 sm:$0xff]  }
  0x73   :  { %1927 = vmatprep.subr.bf16.mxu1 %v2072_v9  ;;  %v2113_v51 = vld [vmem:[%s3153_s4 + $0x4] ss:$8 sps:$4 sm:$0xff]   ;;  %v2119_v53 = vld [vmem:[%s3153_s4 + $0x14] ss:$8 sps:$4 sm:$0xff]   ;;  %v2114_v54 = vld [vmem:[%s3154_s5 + $0x10] ss:$8 sps:$4 sm:$0xff]  }
  0x74   :  { %v2117_v55 = vld [vmem:[%s3153_s4 + $0x10] ss:$8 sps:$4 sm:$0xff]   ;;  %v2122_v56 = vld [vmem:[%s3154_s5 + $0x24] ss:$8 sps:$4 sm:$0xff]   ;;  %v2120_v58 = vld [vmem:[%s3154_s5 + $0x20] ss:$8 sps:$4 sm:$0xff]  }
  0x75   :  { %1997 = vmatpush3.bf16.msra.mxu0 %v2093_v23  ;;  %v2125_v57 = vld [vmem:[%s3153_s4 + $0x24] ss:$8 sps:$4 sm:$0xff]   ;;  %v2123_v59 = vld [vmem:[%s3153_s4 + $0x20] ss:$8 sps:$4 sm:$0xff]   ;;  %v2128_v60 = vld [vmem:[%s3154_s5 + $0x34] ss:$8 sps:$4 sm:$0xff]  }
  0x76   :  { %1928 = vmatpush3.bf16.msra.mxu1 %v2073_v10  ;;  %1998 = vmatprep.subr.bf16.mxu0 %v2481_v0  ;;  %v2131_v61 = vld [vmem:[%s3153_s4 + $0x34] ss:$8 sps:$4 sm:$0xff]   ;;  %v2126_v62 = vld [vmem:[%s3154_s5 + $0x30] ss:$8 sps:$4 sm:$0xff]   ;;  %v2134_v1 = vld [vmem:[%s3154_s5 + $0x44] ss:$8 sps:$4 sm:$0xff]  }
  0x77   :  { %1929 = vmatprep.subr.bf16.mxu1 %v2074_v11  ;;  %v2129_v63 = vld [vmem:[%s3153_s4 + $0x30] ss:$8 sps:$4 sm:$0xff]   ;;  %v2137_v2 = vld [vmem:[%s3153_s4 + $0x44] ss:$8 sps:$4 sm:$0xff]   ;;  %v2132_v3 = vld [vmem:[%s3154_s5 + $0x40] ss:$8 sps:$4 sm:$0xff]  }
  0x78   :  { %v2135_v4 = vld [vmem:[%s3153_s4 + $0x40] ss:$8 sps:$4 sm:$0xff]   ;;  %v2140_v5 = vld [vmem:[%s3154_s5 + $0x54] ss:$8 sps:$4 sm:$0xff]   ;;  %v2138_v7 = vld [vmem:[%s3154_s5 + $0x50] ss:$8 sps:$4 sm:$0xff]  }
  0x79   :  { %1999 = vmatpush3.bf16.msra.mxu0 %v2096_v27  ;;  %v2143_v6 = vld [vmem:[%s3153_s4 + $0x54] ss:$8 sps:$4 sm:$0xff]   ;;  %v2141_v8 = vld [vmem:[%s3153_s4 + $0x50] ss:$8 sps:$4 sm:$0xff]   ;;  %v2146_v9 = vld [vmem:[%s3154_s5 + $0x64] ss:$8 sps:$4 sm:$0xff]  }
  0x7a   :  { %1930 = vmatpush3.bf16.msra.mxu1 %v2075_v14  ;;  %2000 = vmatprep.subr.bf16.mxu0 %v2481_v0  ;;  %v2144_v10 = vld [vmem:[%s3154_s5 + $0x60] ss:$8 sps:$4 sm:$0xff]   ;;  %v2149_v11 = vld [vmem:[%s3153_s4 + $0x64] ss:$8 sps:$4 sm:$0xff]   ;;  %v2152_v13 = vld [vmem:[%s3154_s5 + $0x74] ss:$8 sps:$4 sm:$0xff]  }
  0x7b   :  { %1931 = vmatprep.subr.bf16.mxu1 %v2076_v16  ;;  %v2147_v12 = vld [vmem:[%s3153_s4 + $0x60] ss:$8 sps:$4 sm:$0xff]   ;;  %v2150_v14 = vld [vmem:[%s3154_s5 + $0x70] ss:$8 sps:$4 sm:$0xff]   ;;  %v2155_v15 = vld [vmem:[%s3153_s4 + $0x74] ss:$8 sps:$4 sm:$0xff]  }
  0x7c   :  { %v2153_v16 = vld [vmem:[%s3153_s4 + $0x70] ss:$8 sps:$4 sm:$0xff]   ;;  %v1797_v23 = vld [vmem:[%s3161_s12 + $0x1] ss:$0 sm:$0xff] }
  0x7d   :  { %2001 = vmatpush3.bf16.msra.mxu0 %v2099_v30 }
  0x7e   :  { %1932 = vmatpush3.bf16.msra.mxu1 %v2077_v18  ;;  %2002 = vmatprep.subr.bf16.mxu0 %v2481_v0 }
  0x7f   :  { %1933 = vmatprep.subr.bf16.mxu1 %v2078_v19 }
  0x81   :  { %2003 = vmatpush3.bf16.msra.mxu0 %v2102_v33 }
  0x82   :  { %1934 = vmatpush3.bf16.msra.mxu1 %v2079_v21  ;;  %2004 = vmatprep.subr.bf16.mxu0 %v2481_v0 }
  0x83   :  { %1941 = vmatprep.subr.bf16.mxu1 %v2082_v22 }
  0x85   :  { %433 = vmatmul.mubr.bf16.vlgmr.msra.gmra.mrb[0].mxu1 %v1761_v24  ;;  %2005 = vmatpush3.bf16.msra.mxu0 %v2105_v38 }
  0x86   :  { %1942 = vmatpush3.bf16.msra.mxu1 %v2083_v25  ;;  %472 = vmatprep.mubr.bf16.mxu1 %v1764_v36 }
  0x87   :  { %1943 = vmatprep.subr.bf16.mxu1 %v2085_v26  ;;  %828 = vmatprep.subr.bf16.mxu0 %v2113_v51  ;;  %v2166_v51 = vld [vmem:[#allocation8 + $0x28] sm:$0xff]  }
  0x88   :  { %2007 = vmatmul.mubr.bf16.vlgmr.msra.gmra.mrb[0].mxu0 %v481_v41  ;;  %v2156_v41 = vld [vmem:[#allocation8] sm:$0xff]  }
  0x89   :  { %829 = vmatpush1.bf16.msra.mxu0 %v2111_v50  ;;  %860 = vmatprep.mubr.bf16.mxu0 %v2483_v17  ;;  %v2165_v50 = vld [vmem:[#allocation7 + $0x20] sm:$0xff]  }
  0x8a   :  { %1944 = vmatpush3.bf16.msra.mxu1 %v2086_v28  ;;  %830 = vmatprep.subr.bf16.mxu0 %v2119_v53  ;;  %v2168_v53 = vld [vmem:[#allocation8 + $0x30] sm:$0xff]  }
  0x8b   :  { %1945 = vmatprep.subr.bf16.mxu1 %v2088_v29 }
  0x8d   :  { %831 = vmatpush1.bf16.msra.mxu0 %v2117_v55  ;;  %v2170_v55 = vld [vmem:[#allocation8 + $0x38] sm:$0xff]  }
  0x8e   :  { %1946 = vmatpush3.bf16.msra.mxu1 %v2089_v31  ;;  %832 = vmatprep.subr.bf16.mxu0 %v2125_v57  ;;  %v1760_v31 = vld [vmem:[%s3161_s12] ss:$0 sm:$0xff]  ;;  %v2174_v57 = vld [vmem:[%s3158_s9 + $0x4] ss:$8 sps:$4 sm:$0xff]  }
  0x8f   :  { %1947 = vmatprep.subr.bf16.mxu1 %v2091_v32 }
  0x91   :  { %833 = vmatpush1.bf16.msra.mxu0 %v2123_v59 }
  0x92   :  { %1948 = vmatpush3.bf16.msra.mxu1 %v2092_v35  ;;  %834 = vmatprep.subr.bf16.mxu0 %v2131_v61 }
  0x93   :  { %1949 = vmatprep.subr.bf16.mxu1 %v2094_v37 }
  0x95   :  { %835 = vmatpush1.bf16.msra.mxu0 %v2129_v63  ;;  %v870_v63 = vlaneseq }
  0x96   :  { %1950 = vmatpush3.bf16.msra.mxu1 %v2095_v39  ;;  %836 = vmatprep.subr.bf16.mxu0 %v2137_v2  ;;  %v118_v2 = vld [vmem:[%s3161_s12 + $0x2] sm:$0x3] }
  0x97   :  { %1951 = vmatprep.subr.bf16.mxu1 %v2097_v40 }
  0x99   :  { %837 = vmatpush1.bf16.msra.mxu0 %v2135_v4 }
  0x9a   :  { %1952 = vmatpush3.bf16.msra.mxu1 %v2098_v42  ;;  %838 = vmatprep.subr.bf16.mxu0 %v2143_v6  ;;  %v2157_v42 = vld [vmem:[#allocation7] sm:$0xff]  }
  0x9b   :  { %1953 = vmatprep.subr.bf16.mxu1 %v2100_v43  ;;  %v2158_v43 = vld [vmem:[#allocation8 + $0x8] sm:$0xff]  }
  0x9d   :  { %839 = vmatpush1.bf16.msra.mxu0 %v2141_v8 }
  0x9e   :  { %1954 = vmatpush3.bf16.msra.mxu1 %v2101_v44  ;;  %840 = vmatprep.subr.bf16.mxu0 %v2149_v11  ;;  %v2159_v44 = vld [vmem:[#allocation7 + $0x8] sm:$0xff]  }
  0x9f   :  { %1955 = vmatprep.subr.bf16.mxu1 %v2103_v45  ;;  %v2160_v45 = vld [vmem:[#allocation8 + $0x10] sm:$0xff]  }
  0xa1   :  { %841 = vmatpush1.bf16.msra.mxu0 %v2147_v12 }
  0xa2   :  { %1956 = vmatpush3.bf16.msra.mxu1 %v2104_v46  ;;  %842 = vmatprep.subr.bf16.mxu0 %v2155_v15  ;;  %v2161_v46 = vld [vmem:[#allocation7 + $0x10] sm:$0xff]  }
  0xa3   :  { %707 = vmatprep.subr.bf16.mxu1 %v2110_v49  ;;  %v2164_v49 = vld [vmem:[#allocation8 + $0x20] sm:$0xff]  }
  0xa5   :  { %473 = vmatmul.mubr.bf16.vlgmr.msra.gmra.mrb[4].mxu1 %v1763_v47  ;;  %843 = vmatpush1.bf16.msra.mxu0 %v2153_v16  ;;  %v2162_v47 = vld [vmem:[#allocation8 + $0x18] sm:$0xff]  }
  0xa6   :  { %708 = vmatpush1.bf16.msra.mxu1 %v2108_v48  ;;  %739 = vmatprep.mubr.bf16.mxu1 %v2483_v17  ;;  %v2163_v48 = vld [vmem:[#allocation7 + $0x18] sm:$0xff]  }
  0xa7   :  { %709 = vmatprep.subr.bf16.mxu1 %v2116_v52  ;;  %2030 = vmatprep.subr.bf16.mxu0 %v2481_v0  ;;  %v2167_v52 = vld [vmem:[#allocation7 + $0x28] sm:$0xff]  }
  0xaa   :  { %710 = vmatpush1.bf16.msra.mxu1 %v2114_v54  ;;  %v2169_v54 = vld [vmem:[#allocation7 + $0x30] sm:$0xff]  }
  0xab   :  { %711 = vmatprep.subr.bf16.mxu1 %v2122_v56  ;;  %v2171_v56 = vld [vmem:[#allocation7 + $0x38] sm:$0xff]  }
  0xae   :  { %712 = vmatpush1.bf16.msra.mxu1 %v2120_v58  ;;  %v2222_v58 = vld [vmem:[%s3157_s8 + $0x4] ss:$8 sps:$4 sm:$0xff]  }
  0xaf   :  { %713 = vmatprep.subr.bf16.mxu1 %v2128_v60 }
  0xb2   :  { %714 = vmatpush1.bf16.msra.mxu1 %v2126_v62 }
  0xb3   :  { %715 = vmatprep.subr.bf16.mxu1 %v2134_v1  ;;  %v2918_v1 = vshrl.u32 %v870_v63, 7  ;;  %v2201_v63 = vld [vmem:[%s3159_s10 + $0x14] ss:$8 sps:$4 sm:$0xff]  }
  0xb6   :  { %716 = vmatpush1.bf16.msra.mxu1 %v2132_v3  ;;  %v876_v3 = vsub.s32 1, %v2918_v1 }
  0xb7   :  { %717 = vmatprep.subr.bf16.mxu1 %v2140_v5 }
  0xb8   :  { %v877_v6 = vrot.slane %v118_v2, %v876_v3 }
  0xba   :  { %718 = vmatpush1.bf16.msra.mxu1 %v2138_v7 }
  0xbb   :  { %719 = vmatprep.subr.bf16.mxu1 %v2146_v9 }
  0xbe   :  { %720 = vmatpush1.bf16.msra.mxu1 %v2144_v10 }
  0xbf   :  { %721 = vmatprep.subr.bf16.mxu1 %v2152_v13 }
  0xc2   :  { %722 = vmatpush1.bf16.msra.mxu1 %v2150_v14 }
  0xc3   :  { %2010 = vmatprep.subr.bf16.mxu1 %v2481_v0 }
 0x158   :  { %v1935_v18 = vpop.f32.mrb[0].mxu1 }
 0x159   :  { %v1936_v19 = vpop.f32.mrb[1].mxu1 }
 0x15a   :  { %v1937_v20 = vadd.f32 %v1936_v19, %v1935_v18  ;;  %v1938_v21 = vpop.f32.mrb[2].mxu1 }
 0x15b   :  { %v1939_v22 = vpop.f32.mrb[3].mxu1  ;;  %v586_v24 = vpop.f32.mrb[0].mxu0 }
 0x15c   :  { %v587_v25 = vadd.f32 %v1797_v23, %v586_v24  ;;  %v2008_v26 = vpop.f32.mrb[1].mxu0  ;;  %v435_v34 = vadd.f32 %v1937_v20, %v1760_v31 }
 0x15d   :  { %v589_v27 = vpop.f32.mrb[2].mxu0 }
 0x15e   :  { %v2875_v28 = vmax.f32 %v587_v25, 0.0  ;;  %v2009_v29 = vpop.f32.mrb[3].mxu0 }
 0x160   :  { %v2879_v30 = vpack.c.bf16 %v2875_v28, %v2875_v28 }
 0x162   :  { %1701 = vst [vmem:[#allocation15] sm:$0xf] %v2879_v30  ;;  %740 = vmatmul.mubr.bf16.vlgmr.msra.gmra.mrb[8].mxu1 %v2879_v30 }
 0x163   :  { %2026 = vmatprep.mubr.msk.bf16.mxu1 %vm2482_vm0, %v2481_v0  ;;  %2011 = vmatpush3.bf16.msra.mxu1 %v2156_v41  ;;  %v2228_v41 = vld [vmem:[%s3157_s8 + $0x24] ss:$8 sps:$4 sm:$0xff]  }
 0x164   :  { %2012 = vmatprep.subr.bf16.mxu1 %v2481_v0 }
 0x167   :  { %2013 = vmatpush3.bf16.msra.mxu1 %v2158_v43  ;;  %v2226_v43 = vld [vmem:[%s3157_s8 + $0x20] ss:$8 sps:$4 sm:$0xff]  }
 0x168   :  { %2014 = vmatprep.subr.bf16.mxu1 %v2481_v0 }
 0x16b   :  { %2015 = vmatpush3.bf16.msra.mxu1 %v2160_v45  ;;  %v2231_v45 = vld [vmem:[%s3157_s8 + $0x34] ss:$8 sps:$4 sm:$0xff]  }
 0x16c   :  { %2016 = vmatprep.subr.bf16.mxu1 %v2481_v0 }
 0x16f   :  { %2017 = vmatpush3.bf16.msra.mxu1 %v2162_v47  ;;  %v2229_v47 = vld [vmem:[%s3157_s8 + $0x30] ss:$8 sps:$4 sm:$0xff]  }
 0x170   :  { %2018 = vmatprep.subr.bf16.mxu1 %v2481_v0 }
 0x173   :  { %2019 = vmatpush3.bf16.msra.mxu1 %v2164_v49  ;;  %v2234_v49 = vld [vmem:[%s3157_s8 + $0x44] ss:$8 sps:$4 sm:$0xff]  }
 0x174   :  { %2020 = vmatprep.subr.bf16.mxu1 %v2481_v0 }
 0x177   :  { %2021 = vmatpush3.bf16.msra.mxu1 %v2166_v51  ;;  %v2232_v51 = vld [vmem:[%s3157_s8 + $0x40] ss:$8 sps:$4 sm:$0xff]  }
 0x178   :  { %v1957_v32 = vpop.f32.mrb[4].mxu1  ;;  %2022 = vmatprep.subr.bf16.mxu1 %v2481_v0 }
 0x179   :  { %v1958_v33 = vpop.f32.mrb[5].mxu1 }
 0x17a   :  { %v1959_v35 = vadd.f32 %v1958_v33, %v1957_v32  ;;  %v1960_v36 = vpop.f32.mrb[6].mxu1  ;;  %v2220_v33 = vld [vmem:[%s3157_s8] ss:$8 sps:$4 sm:$0xff]  }
 0x17b   :  { %v1961_v37 = vpop.f32.mrb[7].mxu1  ;;  %2023 = vmatpush3.bf16.msra.mxu1 %v2168_v53  ;;  %v2237_v53 = vld [vmem:[%s3157_s8 + $0x54] ss:$8 sps:$4 sm:$0xff]  }
 0x17c   :  { %v475_v38 = vadd.f32 %v1959_v35, %v435_v34  ;;  %2024 = vmatprep.subr.bf16.mxu1 %v2481_v0  ;;  %v2172_v35 = vld [vmem:[%s3158_s9] ss:$8 sps:$4 sm:$0xff]   ;;  %v2177_v37 = vld [vmem:[%s3158_s9 + $0x14] ss:$8 sps:$4 sm:$0xff]  }
 0x17e   :  { %v2888_v39 = vmax.f32 %v475_v38, 0.0  ;;  %v2223_v38 = vld [vmem:[%s3157_s8 + $0x10] ss:$8 sps:$4 sm:$0xff]  }
 0x17f   :  { %2025 = vmatpush3.bf16.msra.mxu1 %v2170_v55  ;;  %v2235_v55 = vld [vmem:[%s3157_s8 + $0x50] ss:$8 sps:$4 sm:$0xff]  }
 0x180   :  { %v2892_v40 = vpack.c.bf16 %v2888_v39, %v2888_v39  ;;  %1233 = vmatprep.subr.bf16.mxu1 %v2174_v57  ;;  %v2192_v57 = vld [vmem:[%s3158_s9 + $0x64] ss:$8 sps:$4 sm:$0xff]  }
 0x182   :  { %861 = vmatmul.mubr.bf16.vlgmr.msra.gmra.mrb[4].mxu0 %v2892_v40  ;;  %1700 = vst [vmem:[#allocation14] sm:$0xf] %v2892_v40 }
 0x183   :  { %2046 = vmatprep.mubr.msk.bf16.mxu0 %vm2482_vm0, %v2481_v0  ;;  %2031 = vmatpush3.bf16.msra.mxu0 %v2157_v42  ;;  %v2180_v42 = vld [vmem:[%s3158_s9 + $0x24] ss:$8 sps:$4 sm:$0xff]  }
 0x184   :  { %2032 = vmatprep.subr.bf16.mxu0 %v2481_v0 }
 0x187   :  { %2033 = vmatpush3.bf16.msra.mxu0 %v2159_v44  ;;  %v2178_v44 = vld [vmem:[%s3158_s9 + $0x20] ss:$8 sps:$4 sm:$0xff]  }
 0x188   :  { %2034 = vmatprep.subr.bf16.mxu0 %v2481_v0 }
 0x18b   :  { %2035 = vmatpush3.bf16.msra.mxu0 %v2161_v46  ;;  %v2183_v46 = vld [vmem:[%s3158_s9 + $0x34] ss:$8 sps:$4 sm:$0xff]  }
 0x18c   :  { %2036 = vmatprep.subr.bf16.mxu0 %v2481_v0 }
 0x18f   :  { %2037 = vmatpush3.bf16.msra.mxu0 %v2163_v48  ;;  %v2181_v48 = vld [vmem:[%s3158_s9 + $0x30] ss:$8 sps:$4 sm:$0xff]  }
 0x190   :  { %2038 = vmatprep.subr.bf16.mxu0 %v2481_v0 }
 0x193   :  { %2039 = vmatpush3.bf16.msra.mxu0 %v2165_v50  ;;  %v2186_v50 = vld [vmem:[%s3158_s9 + $0x44] ss:$8 sps:$4 sm:$0xff]  }
 0x194   :  { %2040 = vmatprep.subr.bf16.mxu0 %v2481_v0 }
 0x197   :  { %2041 = vmatpush3.bf16.msra.mxu0 %v2167_v52  ;;  %v2184_v52 = vld [vmem:[%s3158_s9 + $0x40] ss:$8 sps:$4 sm:$0xff]  }
 0x198   :  { %2042 = vmatprep.subr.bf16.mxu0 %v2481_v0 }
 0x19b   :  { %2043 = vmatpush3.bf16.msra.mxu0 %v2169_v54  ;;  %v2189_v54 = vld [vmem:[%s3158_s9 + $0x54] ss:$8 sps:$4 sm:$0xff]  }
 0x19c   :  { %2044 = vmatprep.subr.bf16.mxu0 %v2481_v0  ;;  %v872_v0 = vsub.s32 0, %v2918_v1 }
 0x19e   :  { %v873_v4 = vrot.slane %v118_v2, %v872_v0  ;;  %v2199_v2 = vld [vmem:[%s3159_s10 + $0x10] ss:$8 sps:$4 sm:$0xff]  }
 0x19f   :  { %2045 = vmatpush3.bf16.msra.mxu0 %v2171_v56  ;;  %v2187_v56 = vld [vmem:[%s3158_s9 + $0x50] ss:$8 sps:$4 sm:$0xff]  }
 0x1a0   :  { %1354 = vmatprep.subr.bf16.mxu0 %v2222_v58  ;;  %v2190_v58 = vld [vmem:[%s3158_s9 + $0x60] ss:$8 sps:$4 sm:$0xff]  }
 0x235   :  { %v741_v59 = vpop.f32.mrb[8].mxu1 }
 0x236   :  { %v743_v60 = vpop.f32.mrb[9].mxu1 }
 0x237   :  { %v745_v61 = vpop.f32.mrb[10].mxu1 }
 0x238   :  { %v746_v62 = vpop.f32.mrb[11].mxu1  ;;  %v2198_v61 = vld [vmem:[%s3159_s10 + $0x4] ss:$8 sps:$4 sm:$0xff]  }
 0x239   :  { %v2196_v62 = vld [vmem:[%s3159_s10] ss:$8 sps:$4 sm:$0xff]  }
 0x255   :  { %v862_v5 = vpop.f32.mrb[4].mxu0 }
 0x256   :  { %v863_v7 = vadd.f32 %v862_v5, %v741_v59  ;;  %v864_v8 = vpop.f32.mrb[5].mxu0  ;;  %v2195_v59 = vld [vmem:[%s3158_s9 + $0x74] ss:$8 sps:$4 sm:$0xff]   ;;  %v2202_v5 = vld [vmem:[%s3159_s10 + $0x20] ss:$8 sps:$4 sm:$0xff]  }
 0x257   :  { %v865_v9 = vadd.f32 %v864_v8, %v743_v60  ;;  %v866_v10 = vpop.f32.mrb[6].mxu0  ;;  %v2193_v60 = vld [vmem:[%s3158_s9 + $0x70] ss:$8 sps:$4 sm:$0xff]   ;;  %v2208_v8 = vld [vmem:[%s3159_s10 + $0x40] ss:$8 sps:$4 sm:$0xff]  }
 0x258   :  { %v880_v11 = vadd.f32 %v873_v4, %v863_v7  ;;  %v867_v12 = vpop.f32.mrb[7].mxu0  ;;  %v2204_v4 = vld [vmem:[%s3159_s10 + $0x24] ss:$8 sps:$4 sm:$0xff]   ;;  %v2211_v10 = vld [vmem:[%s3159_s10 + $0x50] ss:$8 sps:$4 sm:$0xff]  }
 0x259   :  { %v881_v13 = vadd.f32 %v877_v6, %v865_v9  ;;  %v2205_v6 = vld [vmem:[%s3159_s10 + $0x30] ss:$8 sps:$4 sm:$0xff]   ;;  %v2210_v7 = vld [vmem:[%s3159_s10 + $0x44] ss:$8 sps:$4 sm:$0xff]   ;;  %v2213_v9 = vld [vmem:[%s3159_s10 + $0x54] ss:$8 sps:$4 sm:$0xff]  }
 0x25a   :  { %v1838_v14 = vmul.f32 -1.442695, %v880_v11  ;;  %v2216_v11 = vld [vmem:[%s3159_s10 + $0x64] ss:$8 sps:$4 sm:$0xff]   ;;  %v2214_v12 = vld [vmem:[%s3159_s10 + $0x60] ss:$8 sps:$4 sm:$0xff]  }
 0x25b   :  { %v1839_v15 = vmul.f32 -1.442695, %v881_v13  ;;  %v2219_v13 = vld [vmem:[%s3159_s10 + $0x74] ss:$8 sps:$4 sm:$0xff]  }
 0x25c   :  { %2256 = vpow2.f32 %v1838_v14  ;;  %v2217_v14 = vld [vmem:[%s3159_s10 + $0x70] ss:$8 sps:$4 sm:$0xff]  }
 0x25d   :  { %2258 = vpow2.f32 %v1839_v15  ;;  %v2240_v15 = vld [vmem:[%s3157_s8 + $0x64] ss:$8 sps:$4 sm:$0xff]  }
 0x266   :  { %v2257_v16 = vpop.eup %2256 }
 0x267   :  { %v2259_v18 = vpop.eup %2258  ;;  %v888_v19 = vadd.f32 1.0, %v2257_v16  ;;  %v2238_v16 = vld [vmem:[%s3157_s8 + $0x60] ss:$8 sps:$4 sm:$0xff]  }
 0x268   :  { %v889_v20 = vadd.f32 1.0, %v2259_v18  ;;  %v2243_v18 = vld [vmem:[%s3157_s8 + $0x74] ss:$8 sps:$4 sm:$0xff]  }
 0x269   :  { %2260 = vrcp.f32 %v888_v19  ;;  %v2241_v19 = vld [vmem:[%s3157_s8 + $0x70] ss:$8 sps:$4 sm:$0xff]  }
 0x26a   :  { %2262 = vrcp.f32 %v889_v20  ;;  %v1856_v20 = vld [vmem:[%s3161_s12 + $0x4] ss:$0 sm:$0xff] }
 0x273   :  { %v2261_v21 = vpop.eup %2260 }
 0x274   :  { %v2263_v22 = vpop.eup %2262  ;;  %v895_v23 = vsub.f32 1.0, %v2261_v21  ;;  %v894_v25 = vmul.f32 %v2261_v21, %v2888_v39 }
 0x275   :  { %v899_v24 = vsub.f32 1.0, %v2263_v22  ;;  %v898_v27 = vmul.f32 %v2263_v22, %v2875_v28 }
 0x276   :  { %v896_v26 = vmul.f32 %v895_v23, %v2875_v28  ;;  %v2225_v28 = vld [vmem:[%s3157_s8 + $0x14] ss:$8 sps:$4 sm:$0xff]  }
 0x277   :  { %v900_v29 = vmul.f32 %v899_v24, %v2888_v39  ;;  %v2175_v39 = vld [vmem:[%s3158_s9 + $0x10] ss:$8 sps:$4 sm:$0xff]  }
 0x278   :  { %v897_v31 = vadd.f32 %v896_v26, %v894_v25 }
 0x279   :  { %v901_v32 = vadd.f32 %v900_v29, %v898_v27 }
 0x27a   :  { %v902_v34 = vpack.c.bf16 %v897_v31, %v897_v31 }
 0x27b   :  { %v919_v36 = vpack.c.bf16 %v901_v32, %v901_v32 }
 0x27c   :  { %2047 = vmatmul.mubr.bf16.vlgmr.msra.gmra.mrb[8].mxu0 %v902_v34 }
 0x27d   :  { %2027 = vmatmul.mubr.bf16.vlgmr.msra.gmra.mrb[12].mxu1 %v919_v36  ;;  %1355 = vmatpush1.bf16.msra.mxu0 %v2220_v33  ;;  %v2244_v33 = vld [vmem:[#allocation10] sm:$0xff]   ;;  %v2246_v36 = vld [vmem:[#allocation10 + $0x10] sm:$0xff]  }
 0x27e   :  { %1234 = vmatpush1.bf16.msra.mxu1 %v2172_v35  ;;  %1265 = vmatprep.mubr.bf16.mxu1 %v2483_v17  ;;  %v2245_v35 = vld [vmem:[#allocation10 + $0x8] sm:$0xff]  }
 0x27f   :  { %1235 = vmatprep.subr.bf16.mxu1 %v2177_v37  ;;  %1356 = vmatprep.subr.bf16.mxu0 %v2225_v28  ;;  %v2247_v37 = vld [vmem:[#allocation10 + $0x18] sm:$0xff]   ;;  %v2248_v28 = vld [vmem:[#allocation10 + $0x20] sm:$0xff]  }
 0x280   :  { %1386 = vmatprep.mubr.bf16.mxu0 %v2483_v17 }
 0x281   :  { %1357 = vmatpush1.bf16.msra.mxu0 %v2223_v38  ;;  %v2249_v38 = vld [vmem:[#allocation10 + $0x28] sm:$0xff]  }
 0x282   :  { %1236 = vmatpush1.bf16.msra.mxu1 %v2175_v39  ;;  %1358 = vmatprep.subr.bf16.mxu0 %v2228_v41  ;;  %v2250_v39 = vld [vmem:[#allocation10 + $0x30] sm:$0xff]  }
 0x283   :  { %1237 = vmatprep.subr.bf16.mxu1 %v2180_v42 }
 0x285   :  { %1359 = vmatpush1.bf16.msra.mxu0 %v2226_v43 }
 0x286   :  { %1238 = vmatpush1.bf16.msra.mxu1 %v2178_v44  ;;  %1360 = vmatprep.subr.bf16.mxu0 %v2231_v45  ;;  %v2251_v44 = vld [vmem:[#allocation10 + $0x38] sm:$0xff]  }
 0x287   :  { %1239 = vmatprep.subr.bf16.mxu1 %v2183_v46  ;;  %v2252_v46 = vld [vmem:[#allocation10 + $0x40] sm:$0xff]  }
 0x289   :  { %1361 = vmatpush1.bf16.msra.mxu0 %v2229_v47 }
 0x28a   :  { %1240 = vmatpush1.bf16.msra.mxu1 %v2181_v48  ;;  %1362 = vmatprep.subr.bf16.mxu0 %v2234_v49 }
 0x28b   :  { %1241 = vmatprep.subr.bf16.mxu1 %v2186_v50 }
 0x28d   :  { %1363 = vmatpush1.bf16.msra.mxu0 %v2232_v51  ;;  %v2253_v51 = vld [vmem:[#allocation10 + $0x48] sm:$0xff]  }
 0x28e   :  { %1242 = vmatpush1.bf16.msra.mxu1 %v2184_v52  ;;  %1364 = vmatprep.subr.bf16.mxu0 %v2237_v53  ;;  %v2254_v52 = vld [vmem:[#allocation10 + $0x50] sm:$0xff]   ;;  %v2255_v53 = vld [vmem:[#allocation10 + $0x58] sm:$0xff]  }
 0x28f   :  { %1243 = vmatprep.subr.bf16.mxu1 %v2189_v54  ;;  %v120_v54 = vld [vmem:[%s3161_s12 + $0x5] sm:$0x3] }
 0x291   :  { %1365 = vmatpush1.bf16.msra.mxu0 %v2235_v55 }
 0x292   :  { %1244 = vmatpush1.bf16.msra.mxu1 %v2187_v56  ;;  %1366 = vmatprep.subr.bf16.mxu0 %v2240_v15 }
 0x293   :  { %1245 = vmatprep.subr.bf16.mxu1 %v2192_v57  ;;  %v1538_v57 = vrot.slane %v120_v54, %v872_v0 }
 0x295   :  { %1367 = vmatpush1.bf16.msra.mxu0 %v2238_v16 }
 0x296   :  { %1246 = vmatpush1.bf16.msra.mxu1 %v2190_v58  ;;  %1368 = vmatprep.subr.bf16.mxu0 %v2243_v18 }
 0x297   :  { %1247 = vmatprep.subr.bf16.mxu1 %v2195_v59 }
 0x299   :  { %1369 = vmatpush1.bf16.msra.mxu0 %v2241_v19 }
 0x29a   :  { %1248 = vmatpush1.bf16.msra.mxu1 %v2193_v60  ;;  %1657 = vmatprep.subr.bf16.mxu0 %v2483_v17  ;;  %v1542_v60 = vrot.slane %v120_v54, %v876_v3 }
 0x29b   :  { %1491 = vmatprep.subr.bf16.mxu1 %v2198_v61 }
 0x29d   :  { %1266 = vmatmul.mubr.bf16.vlgmr.msra.gmra.mrb[16].mxu1 %v2892_v40  ;;  %v2207_v40 = vld [vmem:[%s3159_s10 + $0x34] ss:$8 sps:$4 sm:$0xff]  }
 0x29e   :  { %1492 = vmatpush1.bf16.msra.mxu1 %v2196_v62  ;;  %1523 = vmatprep.mubr.bf16.mxu1 %v2483_v17 }
 0x29f   :  { %1493 = vmatprep.subr.bf16.mxu1 %v2201_v63 }
 0x2a2   :  { %1494 = vmatpush1.bf16.msra.mxu1 %v2199_v2 }
 0x2a3   :  { %1495 = vmatprep.subr.bf16.mxu1 %v2204_v4 }
 0x2a6   :  { %1496 = vmatpush1.bf16.msra.mxu1 %v2202_v5 }
 0x2a7   :  { %1497 = vmatprep.subr.bf16.mxu1 %v2207_v40 }
 0x2aa   :  { %1498 = vmatpush1.bf16.msra.mxu1 %v2205_v6 }
 0x2ab   :  { %1499 = vmatprep.subr.bf16.mxu1 %v2210_v7 }
 0x2ae   :  { %1500 = vmatpush1.bf16.msra.mxu1 %v2208_v8 }
 0x2af   :  { %1501 = vmatprep.subr.bf16.mxu1 %v2213_v9 }
 0x2b2   :  { %1502 = vmatpush1.bf16.msra.mxu1 %v2211_v10 }
 0x2b3   :  { %1503 = vmatprep.subr.bf16.mxu1 %v2216_v11 }
 0x2b6   :  { %1504 = vmatpush1.bf16.msra.mxu1 %v2214_v12 }
 0x2b7   :  { %1505 = vmatprep.subr.bf16.mxu1 %v2219_v13 }
 0x2ba   :  { %1506 = vmatpush1.bf16.msra.mxu1 %v2217_v14 }
 0x2bd   :  { %1524 = vmatmul.mubr.bf16.vlgmr.msra.gmra.mrb[20].mxu1 %v2879_v30 }
 0x34f   :  { %v1106_v30 = vpop.f32.mrb[8].mxu0 }
 0x350   :  { %v1018_v21 = vpop.f32.mrb[12].mxu1  ;;  %v2048_v22 = vpop.f32.mrb[9].mxu0 }
 0x351   :  { %v1107_v23 = vadd.f32 %v1106_v30, %v1018_v21  ;;  %v2028_v24 = vpop.f32.mrb[13].mxu1  ;;  %v1109_v25 = vpop.f32.mrb[10].mxu0 }
 0x352   :  { %v1021_v26 = vpop.f32.mrb[14].mxu1  ;;  %v2049_v27 = vpop.f32.mrb[11].mxu0 }
 0x353   :  { %v1118_v29 = vadd.f32 %v1856_v20, %v1107_v23  ;;  %v2029_v31 = vpop.f32.mrb[15].mxu1 }
 0x355   :  { %v1119_v32 = vmax.f32 %v1118_v29, 0.0 }
 0x357   :  { %v1120_v34 = vpack.c.bf16 %v1119_v32, %v1119_v32 }
 0x359   :  { %1699 = vst [vmem:[#allocation12] sm:$0xf] %v1120_v34  ;;  %1387 = vmatmul.mubr.bf16.vlgmr.msra.gmra.mrb[12].mxu0 %v1120_v34 }
 0x35a   :  { %1658 = vmatpush1.bf16.msra.mxu0 %v2244_v33 }
 0x35b   :  { %1659 = vmatprep.subr.bf16.mxu0 %v2483_v17 }
 0x35e   :  { %1660 = vmatpush1.bf16.msra.mxu0 %v2245_v35 }
 0x35f   :  { %1661 = vmatprep.subr.bf16.mxu0 %v2483_v17 }
 0x362   :  { %1662 = vmatpush1.bf16.msra.mxu0 %v2246_v36 }
 0x363   :  { %1663 = vmatprep.subr.bf16.mxu0 %v2483_v17 }
 0x366   :  { %1664 = vmatpush1.bf16.msra.mxu0 %v2247_v37 }
 0x367   :  { %1665 = vmatprep.subr.bf16.mxu0 %v2483_v17 }
 0x36a   :  { %1666 = vmatpush1.bf16.msra.mxu0 %v2248_v28 }
 0x36b   :  { %1667 = vmatprep.subr.bf16.mxu0 %v2483_v17 }
 0x36e   :  { %1668 = vmatpush1.bf16.msra.mxu0 %v2249_v38 }
 0x36f   :  { %1669 = vmatprep.subr.bf16.mxu0 %v2483_v17 }
 0x370   :  { %v1267_v41 = vpop.f32.mrb[16].mxu1 }
 0x371   :  { %v1269_v42 = vpop.f32.mrb[17].mxu1 }
 0x372   :  { %v1271_v43 = vpop.f32.mrb[18].mxu1  ;;  %1670 = vmatpush1.bf16.msra.mxu0 %v2250_v39 }
 0x373   :  { %v1272_v45 = vpop.f32.mrb[19].mxu1  ;;  %1671 = vmatprep.subr.bf16.mxu0 %v2483_v17 }
 0x376   :  { %1672 = vmatpush1.bf16.msra.mxu0 %v2251_v44 }
 0x377   :  { %1673 = vmatprep.subr.bf16.mxu0 %v2483_v17 }
 0x37a   :  { %1674 = vmatpush1.bf16.msra.mxu0 %v2252_v46 }
 0x37b   :  { %1675 = vmatprep.subr.bf16.mxu0 %v2483_v17 }
 0x37e   :  { %1676 = vmatpush1.bf16.msra.mxu0 %v2253_v51 }
 0x37f   :  { %1677 = vmatprep.subr.bf16.mxu0 %v2483_v17 }
 0x382   :  { %1678 = vmatpush1.bf16.msra.mxu0 %v2254_v52 }
 0x383   :  { %1679 = vmatprep.subr.bf16.mxu0 %v2483_v17 }
 0x386   :  { %1680 = vmatpush1.bf16.msra.mxu0 %v2255_v53 }
 0x390   :  { %v1525_v47 = vpop.f32.mrb[20].mxu1 }
 0x391   :  { %v1527_v48 = vpop.f32.mrb[21].mxu1 }
 0x392   :  { %v1529_v49 = vpop.f32.mrb[22].mxu1 }
 0x393   :  { %v1530_v50 = vpop.f32.mrb[23].mxu1 }
 0x42c   :  { %v1388_v55 = vpop.f32.mrb[12].mxu0 }
 0x42d   :  { %v1389_v56 = vadd.f32 %v1388_v55, %v1267_v41  ;;  %v1390_v58 = vpop.f32.mrb[13].mxu0 }
 0x42e   :  { %v1391_v59 = vadd.f32 %v1390_v58, %v1269_v42  ;;  %v1392_v61 = vpop.f32.mrb[14].mxu0 }
 0x42f   :  { %v1532_v62 = vadd.f32 %v1525_v47, %v1389_v56  ;;  %v1393_v63 = vpop.f32.mrb[15].mxu0 }
 0x430   :  { %v1533_v17 = vadd.f32 %v1527_v48, %v1391_v59 }
 0x431   :  { %v1545_v2 = vadd.f32 %v1538_v57, %v1532_v62 }
 0x432   :  { %v1546_v4 = vadd.f32 %v1542_v60, %v1533_v17 }
 0x433   :  { %v1547_v5 = vmax.f32 %v1545_v2, 0.0 }
 0x434   :  { %v1548_v40 = vmax.f32 %v1546_v4, 0.0 }
 0x435   :  { %v1549_v7 = vpack.c.bf16 %v1547_v5, %v1547_v5 }
 0x436   :  { %v1550_v6 = vpack.c.bf16 %v1548_v40, %v1548_v40 }
 0x438   :  { %1918 = vmatprep.mubr.msk.bf16.mxu0 %vm1653_vm1, %v1550_v6 }
 0x439   :  { %1690 = vmatmul.mubr.bf16.vlgmr.msra.gmra.mrb[16].mxu0 %v1549_v7 }
 0x43a   :  { %2385 = shalt.err (!%p2382_p2)
}
 0x43b   :  { %s2386_s26 = scalar_lea.hbm %s3163_s14, 64 }
 0x43c   :  { %p2387_p3 = scmp.ne.s32.totalorder %s3163_s14, %s2386_s26  ;;  %p2390_p4 = scmp.lt.u32.totalorder %s2386_s26, %s3163_s14 }
 0x43e   :  { %p2392_p5 = pnand %p2390_p4, %p2387_p3 }
 0x440   :  { %2395 = shalt.err (!%p2392_p5)
}
 0x441   :  { %1721 = dma.vmem_to_hbm [thread:$0]  %s1719_s20, 64, %s3163_s14, [#allocation13]  }
 0x442   :  { %s2485_s23 = smov [#allocation14]   ;;  %s2486_s5 = smov [#allocation15]  }
 0x443   :  { %s1728_s9 = sshll.u32 %s2485_s23, 4  ;;  %s1738_s11 = sshll.u32 %s2486_s5, 4  ;;  %s1729_s9 = int_to_ptr.vmem [resolvable:$true] %s1728_s9  ;;  %s1739_s11 = int_to_ptr.vmem [resolvable:$true] %s1738_s11 }
 0x444   :  { %s2396_s4 = scalar_lea.vmem %s1729_s9, 64  ;;  %p2401_p7 = scmp.lt.s32.totalorder %s1729_s9, %s1729_s9 }
 0x445   :  { %p2397_p6 = scmp.ne.s32.totalorder %s1729_s9, %s2396_s4  ;;  %p2402_p8 = scmp.lt.s32.totalorder %s2396_s4, %s2396_s4 }
 0x447   :  { %p2403_p9 = por %p2402_p8, %p2401_p7 }
 0x449   :  { %p2404_p10 = pnand %p2403_p9, %p2397_p6 }
 0x44b   :  { %2407 = shalt.err (!%p2404_p10)
}
 0x44c   :  { %s2408_s18 = scalar_lea.hbm %s3164_s15, 64 }
 0x44d   :  { %p2409_p11 = scmp.ne.s32.totalorder %s3164_s15, %s2408_s18  ;;  %p2412_p12 = scmp.lt.u32.totalorder %s2408_s18, %s3164_s15 }
 0x44f   :  { %p2414_p13 = pnand %p2412_p12, %p2409_p11 }
 0x451   :  { %2417 = shalt.err (!%p2414_p13)
}
 0x452   :  { %1731 = dma.vmem_to_hbm [thread:$0]  %s1729_s9, 64, %s3164_s15, [#allocation13]  }
 0x453   :  { %s2418_s2 = scalar_lea.vmem %s1739_s11, 64  ;;  %p2423_p1 = scmp.lt.s32.totalorder %s1739_s11, %s1739_s11 }
 0x454   :  { %p2419_p0 = scmp.ne.s32.totalorder %s1739_s11, %s2418_s2  ;;  %p2424_p2 = scmp.lt.s32.totalorder %s2418_s2, %s2418_s2 }
 0x456   :  { %p2425_p3 = por %p2424_p2, %p2423_p1 }
 0x458   :  { %p2426_p4 = pnand %p2425_p3, %p2419_p0 }
 0x45a   :  { %2429 = shalt.err (!%p2426_p4)
}
 0x45b   :  { %s2430_s24 = scalar_lea.hbm %s3165_s16, 64 }
 0x45c   :  { %p2431_p5 = scmp.ne.s32.totalorder %s3165_s16, %s2430_s24  ;;  %p2434_p6 = scmp.lt.u32.totalorder %s2430_s24, %s3165_s16 }
 0x45e   :  { %p2436_p7 = pnand %p2434_p6, %p2431_p5 }
 0x460   :  { %2439 = shalt.err (!%p2436_p7)
}
 0x461   :  { %1741 = dma.vmem_to_hbm [thread:$0]  %s1739_s11, 64, %s3165_s16, [#allocation16]   ;;  %v1905_v1 = vld [vmem:[%s3161_s12 + $0x7] ss:$0 sm:$0xff] }
 0x462   :  { %s2487_s29 = smov [#allocation11]  }
 0x463   :  { %s1708_s21 = sshll.u32 %s2487_s29, 4  ;;  %s1709_s21 = int_to_ptr.vmem [resolvable:$true] %s1708_s21 }
 0x464   :  { %s2440_s23 = scalar_lea.vmem %s1709_s21, 64  ;;  %p2445_p9 = scmp.lt.s32.totalorder %s1709_s21, %s1709_s21 }
 0x465   :  { %p2441_p8 = scmp.ne.s32.totalorder %s1709_s21, %s2440_s23  ;;  %p2446_p10 = scmp.lt.s32.totalorder %s2440_s23, %s2440_s23 }
 0x467   :  { %p2447_p11 = por %p2446_p10, %p2445_p9 }
 0x469   :  { %p2448_p12 = pnand %p2447_p11, %p2441_p8 }
 0x50c   :  { %v1691_v0 = vpop.f32.mrb[16].mxu0 }
 0x50d   :  { %v1692_v3 = vadd.f32 %v1905_v1, %v1691_v0  ;;  %v1693_v8 = vpop.f32.mrb[17].mxu0 }
 0x50e   :  { %v1694_v9 = vpop.f32.mrb[18].mxu0 }
 0x50f   :  { %v1697_v10 = vpack.c.bf16 %v1692_v3, %v1692_v3  ;;  %v1695_v11 = vpop.f32.mrb[19].mxu0 }
 0x511   :  { %1698 = vst [vmem:[#allocation11] sm:$0xf] %v1697_v10 }
 0x512   :  { %2451 = shalt.err (!%p2448_p12)
}
 0x513   :  { %s2452_s12 = scalar_lea.hbm %s3162_s13, 64 }
 0x514   :  { %p2453_p13 = scmp.ne.s32.totalorder %s3162_s13, %s2452_s12  ;;  %p2456_p0 = scmp.lt.u32.totalorder %s2452_s12, %s3162_s13 }
 0x516   :  { %p2458_p1 = pnand %p2456_p0, %p2453_p13 }
 0x518   :  { %2461 = shalt.err (!%p2458_p1)
}
 0x519   :  { %1711 = dma.vmem_to_hbm [thread:$0]  %s1709_s21, 64, %s3162_s13, [#allocation4]  }
 0x51a   :  { %2468 = dma.done.wait [#allocation4], 64  }
 0x51b   :  { %2469 = vsyncadd [#allocation4], 4294967232 }
 0x51c   :  { %2470 = dma.done.wait [#allocation13], 128  }
 0x51d   :  { %2471 = vsyncadd [#allocation13], 4294967168 }
 0x51e   :  { %2472 = dma.done.wait [#allocation16], 64  }
 0x51f   :  { %2473 = vsyncadd [#allocation16], 4294967232 }
 0x520   :  { %1754 = vsyncpa [#allocation3], 1 }
 0x521   :  { %1755 = vsyncpa [#allocation6], 1 }
 0x522   :  { %1756 = vsyncpa [#allocation9], 1 }
 0x523   :  { %1757 = vsyncpa [#allocation4], 1 }
 0x524   :  { %1758 = vsyncpa [#allocation13], 1 }
 0x525   :  { %1759 = vsyncpa [#allocation16], 1 }

</bundles_post_ra>
